<compile_context>
chip_gen: v7x
topology: tpu7x:2x2x1
jax: 0.10.0
libtpu: 0.0.40
codegen_flags: <defaults>
</compile_context>

<pallas_src>
import functools

import jax
import jax.numpy as jnp
from jax.experimental import pallas as pl
from jax.experimental.pallas import tpu as pltpu

_NEG_SLOPE = 0.01          # PyTorch nn.LeakyReLU() default negative slope.
_DEFAULT_BATCH_TILE = 256  # v6e/v7x MXU is 2x256x256; use 128 on v5e.


def _round_up(x, m):
    return ((x + m - 1) // m) * m


def _fused_mlp_kernel(*refs, precision=None):
    """refs = (x_ref, w0, b0, w1, b1, ..., wL-1, bL-1, o_ref).

    One batch tile per grid step; all 12 layers statically unrolled so the
    intermediate activations never leave vregs/VMEM (no HBM round-trips).
    """
    x_ref = refs[0]
    o_ref = refs[-1]
    wb_refs = refs[1:-1]
    n_layers = len(wb_refs) // 2

    out = x_ref[...].astype(jnp.float32)
    # TODO(synk): the first few tiny layers (Din <= 32) could run as VPU
    # broadcast-FMAs to shave serial MXU round-trips; skipped (sub-us win).
    for i in range(n_layers):
        w = wb_refs[2 * i][...]                          # (Din, Dout) f32/bf16
        b = wb_refs[2 * i + 1][...].astype(jnp.float32)  # (1, Dout)
        # MXU matmul in the weight dtype (bf16 native on v6e/v7x), f32
        # accumulation; epilogue (bias + LeakyReLU) in f32 on the VPU.
        y = jnp.dot(out.astype(w.dtype), w,
                    preferred_element_type=jnp.float32,
                    precision=precision)
        y = y + b
        out = jnp.maximum(y, _NEG_SLOPE * y)             # LeakyReLU
    o_ref[...] = out.astype(o_ref.dtype)


def _vmem_limit_bytes(params, batch_tile):
    """Padded-footprint estimate: 2x (double-buffered) weights + live f32
    activation slabs at the widest layer + pipelined in/out tiles + slack."""
    def pad(n, m):
        return max(m, _round_up(n, m))

    wbytes = 0
    max_dout = 0
    for w, b in params:
        din, dout = w.shape
        wbytes += pad(din, 8) * pad(dout, 128) * jnp.dtype(w.dtype).itemsize
        wbytes += 8 * pad(dout, 128) * jnp.dtype(b.dtype).itemsize
        max_dout = max(max_dout, dout)
    act = 3 * batch_tile * pad(max_dout, 128) * 4
    io = 4 * batch_tile * 128 * 4
    total = 2 * wbytes + act + io + (2 << 20)
    return int(min(max(total, 8 << 20), 64 << 20))


def q_layer_forward(motor_control, params, *, batch_tile=None, precision=None):
    """Fused forward pass: one pallas_call for the whole MLP.

    motor_control: (B, inputdim); params: list of (w, b) with w:(Din, Dout)
    f32 or bf16 and b:(1, Dout) f32. batch_tile: rows per grid step (128 on
    v5e, 256 on v6e/v7x). precision: optional lax.Precision for the f32 path
    (HIGHEST for bit-parity with an f32 reference).

    TODO(synk): if called every step of an RL rollout at tiny B, batch across
    the loop or keep weights VMEM-resident across calls (cross-pallas_call
    prefetch); otherwise per-call weight copy-in + dispatch dominates.
    """
    B, inputdim = motor_control.shape
    n_joint = params[-1][0].shape[1]

    padded_B = _round_up(B, 8)                 # sublane pad: literally free.
    if batch_tile is None:
        batch_tile = min(padded_B, _DEFAULT_BATCH_TILE)
    batch_tile = _round_up(batch_tile, 8)
    padded_B = _round_up(padded_B, batch_tile)
    grid = (padded_B // batch_tile,)

    x = motor_control.astype(jnp.float32)
    if padded_B != B:
        x = jnp.pad(x, ((0, padded_B - B), (0, 0)))

    flat, wb_specs = [], []
    for w, b in params:
        flat += [w, b]
        # Constant block index => weights/biases stay VMEM-resident across
        # batch tiles (fetched once per kernel launch, never re-DMAed).
        wb_specs.append(pl.BlockSpec(w.shape, lambda i: (0, 0)))
        wb_specs.append(pl.BlockSpec(b.shape, lambda i: (0, 0)))

    out = pl.pallas_call(
        functools.partial(_fused_mlp_kernel, precision=precision),
        out_shape=jax.ShapeDtypeStruct((padded_B, n_joint), jnp.float32),
        grid=grid,
        in_specs=[pl.BlockSpec((batch_tile, inputdim), lambda i: (i, 0))]
                 + wb_specs,
        out_specs=pl.BlockSpec((batch_tile, n_joint), lambda i: (i, 0)),
        compiler_params=pltpu.CompilerParams(
            # Batch tiles are independent -> shard across v7x's 2 TensorCores.
            dimension_semantics=("parallel",),
            vmem_limit_bytes=_vmem_limit_bytes(params, batch_tile),
        ),
    )(x, *flat)
    return out[:B]


def init_q_layer_params(key, n_joint, inputdim, n_layers=7,
                        weight_dtype=jnp.float32):
    """Deterministic synthetic init matching the PyTorch module's shapes.

    Weights: Xavier-uniform; biases: PyTorch Linear default
    U(-1/sqrt(fan_in), 1/sqrt(fan_in)). Weights stored (in, out), biases
    stored (1, out) so the kernel never reshapes.
    """
    dims = []
    d = inputdim
    for _ in range(n_layers):
        dims.append((d, 2 * d))
        d = d * 2
    for _ in range(n_layers - 3):
        dims.append((d, d // 2))
        d = d // 2
    dims.append((d, n_joint))

    params = []
    for (din, dout) in dims:
        key, kw, kb = jax.random.split(key, 3)
        bound_w = (6.0 / (din + dout)) ** 0.5
        w = jax.random.uniform(kw, (din, dout), jnp.float32, -bound_w, bound_w)
        bound_b = 1.0 / (din ** 0.5)
        b = jax.random.uniform(kb, (1, dout), jnp.float32, -bound_b, bound_b)
        params.append((w.astype(weight_dtype), b))
    return params


def _reference_forward(x, params):
    """Plain-JAX reference with matching dtype handling (f32 accumulate)."""
    out = x.astype(jnp.float32)
    for w, b in params:
        y = jnp.dot(out.astype(w.dtype), w,
                    preferred_element_type=jnp.float32) + b.astype(jnp.float32)
        out = jnp.maximum(y, _NEG_SLOPE * y)
    return out


if __name__ == "__main__":
    key = jax.random.PRNGKey(0)
    k_params, k_x, k_x2 = jax.random.split(key, 3)

    batch, inputdim, n_joint, n_layers = 2, 4, 4, 7

    params_f32 = init_q_layer_params(k_params, n_joint, inputdim, n_layers)
    params_bf16 = [(w.astype(jnp.bfloat16), b) for w, b in params_f32]

    x = jax.random.normal(k_x, (batch, inputdim), dtype=jnp.float32)

    # 1) f32-weight path at the module's small shape (B=2, padded to 8 rows).
    q_value = q_layer_forward(x, params_f32)
    jax.block_until_ready(q_value)
    assert q_value.shape == (batch, n_joint), q_value.shape
    assert q_value.dtype == jnp.float32
    ref_f32 = _reference_forward(x, params_f32)
    assert jnp.allclose(q_value, ref_f32, rtol=1e-5, atol=1e-5), (
        float(jnp.max(jnp.abs(q_value - ref_f32))))

    # 2) bf16-weight path (halved weight copy-in, native MXU bf16 on v6e/v7x).
    q_bf16 = q_layer_forward(x, params_bf16)
    jax.block_until_ready(q_bf16)
    ref_bf16 = _reference_forward(x, params_bf16)
    assert jnp.allclose(q_bf16, ref_bf16, rtol=1e-3, atol=1e-3), (
        float(jnp.max(jnp.abs(q_bf16 - ref_bf16))))

    # 3) Batched path exercising the batch grid (grid=(2,), weight-resident
    #    constant-index BlockSpecs, parallel dimension semantics).
    xb = jax.random.normal(k_x2, (256, inputdim), dtype=jnp.float32)
    q_b = q_layer_forward(xb, params_bf16, batch_tile=128)
    jax.block_until_ready(q_b)
    assert q_b.shape == (256, n_joint)
    ref_b = _reference_forward(xb, params_bf16)
    assert jnp.allclose(q_b, ref_b, rtol=1e-3, atol=1e-3), (
        float(jnp.max(jnp.abs(q_b - ref_b))))

    print("KERNEL_OK")
</pallas_src>

<mosaic_0001>
module attributes {stable_mosaic.version = 11 : i64} {
  func.func @_fused_mlp_kernel(%arg0: i32, %arg1: memref<8x4xf32, #tpu.memory_space<vmem>>, %arg2: memref<4x8xf32, #tpu.memory_space<vmem>>, %arg3: memref<1x8xf32, #tpu.memory_space<vmem>>, %arg4: memref<8x16xf32, #tpu.memory_space<vmem>>, %arg5: memref<1x16xf32, #tpu.memory_space<vmem>>, %arg6: memref<16x32xf32, #tpu.memory_space<vmem>>, %arg7: memref<1x32xf32, #tpu.memory_space<vmem>>, %arg8: memref<32x64xf32, #tpu.memory_space<vmem>>, %arg9: memref<1x64xf32, #tpu.memory_space<vmem>>, %arg10: memref<64x128xf32, #tpu.memory_space<vmem>>, %arg11: memref<1x128xf32, #tpu.memory_space<vmem>>, %arg12: memref<128x256xf32, #tpu.memory_space<vmem>>, %arg13: memref<1x256xf32, #tpu.memory_space<vmem>>, %arg14: memref<256x512xf32, #tpu.memory_space<vmem>>, %arg15: memref<1x512xf32, #tpu.memory_space<vmem>>, %arg16: memref<512x256xf32, #tpu.memory_space<vmem>>, %arg17: memref<1x256xf32, #tpu.memory_space<vmem>>, %arg18: memref<256x128xf32, #tpu.memory_space<vmem>>, %arg19: memref<1x128xf32, #tpu.memory_space<vmem>>, %arg20: memref<128x64xf32, #tpu.memory_space<vmem>>, %arg21: memref<1x64xf32, #tpu.memory_space<vmem>>, %arg22: memref<64x32xf32, #tpu.memory_space<vmem>>, %arg23: memref<1x32xf32, #tpu.memory_space<vmem>>, %arg24: memref<32x4xf32, #tpu.memory_space<vmem>>, %arg25: memref<1x4xf32, #tpu.memory_space<vmem>>, %arg26: memref<8x4xf32, #tpu.memory_space<vmem>>) attributes {dimension_semantics = [#tpu.dimension_semantics<parallel>], iteration_bounds = array<i64: 1>, scalar_prefetch = 0 : i64, scratch_operands = 0 : i64, tpu.core_type = #tpu.core_type<tc>, window_params = [{transform_indices = @transform_0, window_bounds = array<i64: 8, 4>}, {pipeline_mode = #tpu.pipeline_mode<synchronous>, transform_indices = @transform_1, window_bounds = array<i64: 4, 8>}, {pipeline_mode = #tpu.pipeline_mode<synchronous>, transform_indices = @transform_2, window_bounds = array<i64: 1, 8>}, {pipeline_mode = #tpu.pipeline_mode<synchronous>, transform_indices = @transform_3, window_bounds = array<i64: 8, 16>}, {pipeline_mode = #tpu.pipeline_mode<synchronous>, transform_indices = @transform_4, window_bounds = array<i64: 1, 16>}, {pipeline_mode = #tpu.pipeline_mode<synchronous>, transform_indices = @transform_5, window_bounds = array<i64: 16, 32>}, {pipeline_mode = #tpu.pipeline_mode<synchronous>, transform_indices = @transform_6, window_bounds = array<i64: 1, 32>}, {pipeline_mode = #tpu.pipeline_mode<synchronous>, transform_indices = @transform_7, window_bounds = array<i64: 32, 64>}, {pipeline_mode = #tpu.pipeline_mode<synchronous>, transform_indices = @transform_8, window_bounds = array<i64: 1, 64>}, {pipeline_mode = #tpu.pipeline_mode<synchronous>, transform_indices = @transform_9, window_bounds = array<i64: 64, 128>}, {pipeline_mode = #tpu.pipeline_mode<synchronous>, transform_indices = @transform_10, window_bounds = array<i64: 1, 128>}, {pipeline_mode = #tpu.pipeline_mode<synchronous>, transform_indices = @transform_11, window_bounds = array<i64: 128, 256>}, {pipeline_mode = #tpu.pipeline_mode<synchronous>, transform_indices = @transform_12, window_bounds = array<i64: 1, 256>}, {pipeline_mode = #tpu.pipeline_mode<synchronous>, transform_indices = @transform_13, window_bounds = array<i64: 256, 512>}, {pipeline_mode = #tpu.pipeline_mode<synchronous>, transform_indices = @transform_14, window_bounds = array<i64: 1, 512>}, {pipeline_mode = #tpu.pipeline_mode<synchronous>, transform_indices = @transform_15, window_bounds = array<i64: 512, 256>}, {pipeline_mode = #tpu.pipeline_mode<synchronous>, transform_indices = @transform_16, window_bounds = array<i64: 1, 256>}, {pipeline_mode = #tpu.pipeline_mode<synchronous>, transform_indices = @transform_17, window_bounds = array<i64: 256, 128>}, {pipeline_mode = #tpu.pipeline_mode<synchronous>, transform_indices = @transform_18, window_bounds = array<i64: 1, 128>}, {pipeline_mode = #tpu.pipeline_mode<synchronous>, transform_indices = @transform_19, window_bounds = array<i64: 128, 64>}, {pipeline_mode = #tpu.pipeline_mode<synchronous>, transform_indices = @transform_20, window_bounds = array<i64: 1, 64>}, {pipeline_mode = #tpu.pipeline_mode<synchronous>, transform_indices = @transform_21, window_bounds = array<i64: 64, 32>}, {pipeline_mode = #tpu.pipeline_mode<synchronous>, transform_indices = @transform_22, window_bounds = array<i64: 1, 32>}, {pipeline_mode = #tpu.pipeline_mode<synchronous>, transform_indices = @transform_23, window_bounds = array<i64: 32, 4>}, {pipeline_mode = #tpu.pipeline_mode<synchronous>, transform_indices = @transform_24, window_bounds = array<i64: 1, 4>}, {transform_indices = @transform_25, window_bounds = array<i64: 8, 4>}]} {
    %c0 = arith.constant 0 : index
    %c0_0 = arith.constant 0 : index
    %0 = vector.load %arg1[%c0, %c0_0] : memref<8x4xf32, #tpu.memory_space<vmem>>, vector<8x4xf32>
    %c0_1 = arith.constant 0 : index
    %c0_2 = arith.constant 0 : index
    %1 = vector.load %arg2[%c0_1, %c0_2] : memref<4x8xf32, #tpu.memory_space<vmem>>, vector<4x8xf32>
    %c0_3 = arith.constant 0 : index
    %c0_4 = arith.constant 0 : index
    %2 = vector.load %arg3[%c0_3, %c0_4] : memref<1x8xf32, #tpu.memory_space<vmem>>, vector<1x8xf32>
    %cst = arith.constant dense<0.000000e+00> : vector<8x8xf32>
    %3 = tpu.matmul %0, %1, %cst {dimension_numbers = #tpu.dot_dimension_numbers<[1], [0], [0], [1], [0, 0, 1, 1], [], []>} : vector<8x4xf32>, vector<4x8xf32>, vector<8x8xf32> -> vector<8x8xf32>
    %4 = vector.broadcast %2 : vector<1x8xf32> to vector<8x8xf32>
    %5 = arith.addf %3, %4 : vector<8x8xf32>
    %cst_5 = arith.constant 0.00999999977 : f32
    %6 = vector.broadcast %cst_5 : f32 to vector<8x8xf32>
    %7 = arith.mulf %6, %5 : vector<8x8xf32>
    %8 = arith.maximumf %5, %7 : vector<8x8xf32>
    %c0_6 = arith.constant 0 : index
    %c0_7 = arith.constant 0 : index
    %9 = vector.load %arg4[%c0_6, %c0_7] : memref<8x16xf32, #tpu.memory_space<vmem>>, vector<8x16xf32>
    %c0_8 = arith.constant 0 : index
    %c0_9 = arith.constant 0 : index
    %10 = vector.load %arg5[%c0_8, %c0_9] : memref<1x16xf32, #tpu.memory_space<vmem>>, vector<1x16xf32>
    %cst_10 = arith.constant dense<0.000000e+00> : vector<8x16xf32>
    %11 = tpu.matmul %8, %9, %cst_10 {dimension_numbers = #tpu.dot_dimension_numbers<[1], [0], [0], [1], [0, 0, 1, 1], [], []>} : vector<8x8xf32>, vector<8x16xf32>, vector<8x16xf32> -> vector<8x16xf32>
    %12 = vector.broadcast %10 : vector<1x16xf32> to vector<8x16xf32>
    %13 = arith.addf %11, %12 : vector<8x16xf32>
    %cst_11 = arith.constant 0.00999999977 : f32
    %14 = vector.broadcast %cst_11 : f32 to vector<8x16xf32>
    %15 = arith.mulf %14, %13 : vector<8x16xf32>
    %16 = arith.maximumf %13, %15 : vector<8x16xf32>
    %c0_12 = arith.constant 0 : index
    %c0_13 = arith.constant 0 : index
    %17 = vector.load %arg6[%c0_12, %c0_13] : memref<16x32xf32, #tpu.memory_space<vmem>>, vector<16x32xf32>
    %c0_14 = arith.constant 0 : index
    %c0_15 = arith.constant 0 : index
    %18 = vector.load %arg7[%c0_14, %c0_15] : memref<1x32xf32, #tpu.memory_space<vmem>>, vector<1x32xf32>
    %cst_16 = arith.constant dense<0.000000e+00> : vector<8x32xf32>
    %19 = tpu.matmul %16, %17, %cst_16 {dimension_numbers = #tpu.dot_dimension_numbers<[1], [0], [0], [1], [0, 0, 1, 1], [], []>} : vector<8x16xf32>, vector<16x32xf32>, vector<8x32xf32> -> vector<8x32xf32>
    %20 = vector.broadcast %18 : vector<1x32xf32> to vector<8x32xf32>
    %21 = arith.addf %19, %20 : vector<8x32xf32>
    %cst_17 = arith.constant 0.00999999977 : f32
    %22 = vector.broadcast %cst_17 : f32 to vector<8x32xf32>
    %23 = arith.mulf %22, %21 : vector<8x32xf32>
    %24 = arith.maximumf %21, %23 : vector<8x32xf32>
    %c0_18 = arith.constant 0 : index
    %c0_19 = arith.constant 0 : index
    %25 = vector.load %arg8[%c0_18, %c0_19] : memref<32x64xf32, #tpu.memory_space<vmem>>, vector<32x64xf32>
    %c0_20 = arith.constant 0 : index
    %c0_21 = arith.constant 0 : index
    %26 = vector.load %arg9[%c0_20, %c0_21] : memref<1x64xf32, #tpu.memory_space<vmem>>, vector<1x64xf32>
    %cst_22 = arith.constant dense<0.000000e+00> : vector<8x64xf32>
    %27 = tpu.matmul %24, %25, %cst_22 {dimension_numbers = #tpu.dot_dimension_numbers<[1], [0], [0], [1], [0, 0, 1, 1], [], []>} : vector<8x32xf32>, vector<32x64xf32>, vector<8x64xf32> -> vector<8x64xf32>
    %28 = vector.broadcast %26 : vector<1x64xf32> to vector<8x64xf32>
    %29 = arith.addf %27, %28 : vector<8x64xf32>
    %cst_23 = arith.constant 0.00999999977 : f32
    %30 = vector.broadcast %cst_23 : f32 to vector<8x64xf32>
    %31 = arith.mulf %30, %29 : vector<8x64xf32>
    %32 = arith.maximumf %29, %31 : vector<8x64xf32>
    %c0_24 = arith.constant 0 : index
    %c0_25 = arith.constant 0 : index
    %33 = vector.load %arg10[%c0_24, %c0_25] : memref<64x128xf32, #tpu.memory_space<vmem>>, vector<64x128xf32>
    %c0_26 = arith.constant 0 : index
    %c0_27 = arith.constant 0 : index
    %34 = vector.load %arg11[%c0_26, %c0_27] : memref<1x128xf32, #tpu.memory_space<vmem>>, vector<1x128xf32>
    %cst_28 = arith.constant dense<0.000000e+00> : vector<8x128xf32>
    %35 = tpu.matmul %32, %33, %cst_28 {dimension_numbers = #tpu.dot_dimension_numbers<[1], [0], [0], [1], [0, 0, 1, 1], [], []>} : vector<8x64xf32>, vector<64x128xf32>, vector<8x128xf32> -> vector<8x128xf32>
    %36 = vector.broadcast %34 : vector<1x128xf32> to vector<8x128xf32>
    %37 = arith.addf %35, %36 : vector<8x128xf32>
    %cst_29 = arith.constant 0.00999999977 : f32
    %38 = vector.broadcast %cst_29 : f32 to vector<8x128xf32>
    %39 = arith.mulf %38, %37 : vector<8x128xf32>
    %40 = arith.maximumf %37, %39 : vector<8x128xf32>
    %c0_30 = arith.constant 0 : index
    %c0_31 = arith.constant 0 : index
    %41 = vector.load %arg12[%c0_30, %c0_31] : memref<128x256xf32, #tpu.memory_space<vmem>>, vector<128x256xf32>
    %c0_32 = arith.constant 0 : index
    %c0_33 = arith.constant 0 : index
    %42 = vector.load %arg13[%c0_32, %c0_33] : memref<1x256xf32, #tpu.memory_space<vmem>>, vector<1x256xf32>
    %cst_34 = arith.constant dense<0.000000e+00> : vector<8x256xf32>
    %43 = tpu.matmul %40, %41, %cst_34 {dimension_numbers = #tpu.dot_dimension_numbers<[1], [0], [0], [1], [0, 0, 1, 1], [], []>} : vector<8x128xf32>, vector<128x256xf32>, vector<8x256xf32> -> vector<8x256xf32>
    %44 = vector.broadcast %42 : vector<1x256xf32> to vector<8x256xf32>
    %45 = arith.addf %43, %44 : vector<8x256xf32>
    %cst_35 = arith.constant 0.00999999977 : f32
    %46 = vector.broadcast %cst_35 : f32 to vector<8x256xf32>
    %47 = arith.mulf %46, %45 : vector<8x256xf32>
    %48 = arith.maximumf %45, %47 : vector<8x256xf32>
    %c0_36 = arith.constant 0 : index
    %c0_37 = arith.constant 0 : index
    %49 = vector.load %arg14[%c0_36, %c0_37] : memref<256x512xf32, #tpu.memory_space<vmem>>, vector<256x512xf32>
    %c0_38 = arith.constant 0 : index
    %c0_39 = arith.constant 0 : index
    %50 = vector.load %arg15[%c0_38, %c0_39] : memref<1x512xf32, #tpu.memory_space<vmem>>, vector<1x512xf32>
    %cst_40 = arith.constant dense<0.000000e+00> : vector<8x512xf32>
    %51 = tpu.matmul %48, %49, %cst_40 {dimension_numbers = #tpu.dot_dimension_numbers<[1], [0], [0], [1], [0, 0, 1, 1], [], []>} : vector<8x256xf32>, vector<256x512xf32>, vector<8x512xf32> -> vector<8x512xf32>
    %52 = vector.broadcast %50 : vector<1x512xf32> to vector<8x512xf32>
    %53 = arith.addf %51, %52 : vector<8x512xf32>
    %cst_41 = arith.constant 0.00999999977 : f32
    %54 = vector.broadcast %cst_41 : f32 to vector<8x512xf32>
    %55 = arith.mulf %54, %53 : vector<8x512xf32>
    %56 = arith.maximumf %53, %55 : vector<8x512xf32>
    %c0_42 = arith.constant 0 : index
    %c0_43 = arith.constant 0 : index
    %57 = vector.load %arg16[%c0_42, %c0_43] : memref<512x256xf32, #tpu.memory_space<vmem>>, vector<512x256xf32>
    %c0_44 = arith.constant 0 : index
    %c0_45 = arith.constant 0 : index
    %58 = vector.load %arg17[%c0_44, %c0_45] : memref<1x256xf32, #tpu.memory_space<vmem>>, vector<1x256xf32>
    %cst_46 = arith.constant dense<0.000000e+00> : vector<8x256xf32>
    %59 = tpu.matmul %56, %57, %cst_46 {dimension_numbers = #tpu.dot_dimension_numbers<[1], [0], [0], [1], [0, 0, 1, 1], [], []>} : vector<8x512xf32>, vector<512x256xf32>, vector<8x256xf32> -> vector<8x256xf32>
    %60 = vector.broadcast %58 : vector<1x256xf32> to vector<8x256xf32>
    %61 = arith.addf %59, %60 : vector<8x256xf32>
    %cst_47 = arith.constant 0.00999999977 : f32
    %62 = vector.broadcast %cst_47 : f32 to vector<8x256xf32>
    %63 = arith.mulf %62, %61 : vector<8x256xf32>
    %64 = arith.maximumf %61, %63 : vector<8x256xf32>
    %c0_48 = arith.constant 0 : index
    %c0_49 = arith.constant 0 : index
    %65 = vector.load %arg18[%c0_48, %c0_49] : memref<256x128xf32, #tpu.memory_space<vmem>>, vector<256x128xf32>
    %c0_50 = arith.constant 0 : index
    %c0_51 = arith.constant 0 : index
    %66 = vector.load %arg19[%c0_50, %c0_51] : memref<1x128xf32, #tpu.memory_space<vmem>>, vector<1x128xf32>
    %cst_52 = arith.constant dense<0.000000e+00> : vector<8x128xf32>
    %67 = tpu.matmul %64, %65, %cst_52 {dimension_numbers = #tpu.dot_dimension_numbers<[1], [0], [0], [1], [0, 0, 1, 1], [], []>} : vector<8x256xf32>, vector<256x128xf32>, vector<8x128xf32> -> vector<8x128xf32>
    %68 = vector.broadcast %66 : vector<1x128xf32> to vector<8x128xf32>
    %69 = arith.addf %67, %68 : vector<8x128xf32>
    %cst_53 = arith.constant 0.00999999977 : f32
    %70 = vector.broadcast %cst_53 : f32 to vector<8x128xf32>
    %71 = arith.mulf %70, %69 : vector<8x128xf32>
    %72 = arith.maximumf %69, %71 : vector<8x128xf32>
    %c0_54 = arith.constant 0 : index
    %c0_55 = arith.constant 0 : index
    %73 = vector.load %arg20[%c0_54, %c0_55] : memref<128x64xf32, #tpu.memory_space<vmem>>, vector<128x64xf32>
    %c0_56 = arith.constant 0 : index
    %c0_57 = arith.constant 0 : index
    %74 = vector.load %arg21[%c0_56, %c0_57] : memref<1x64xf32, #tpu.memory_space<vmem>>, vector<1x64xf32>
    %cst_58 = arith.constant dense<0.000000e+00> : vector<8x64xf32>
    %75 = tpu.matmul %72, %73, %cst_58 {dimension_numbers = #tpu.dot_dimension_numbers<[1], [0], [0], [1], [0, 0, 1, 1], [], []>} : vector<8x128xf32>, vector<128x64xf32>, vector<8x64xf32> -> vector<8x64xf32>
    %76 = vector.broadcast %74 : vector<1x64xf32> to vector<8x64xf32>
    %77 = arith.addf %75, %76 : vector<8x64xf32>
    %cst_59 = arith.constant 0.00999999977 : f32
    %78 = vector.broadcast %cst_59 : f32 to vector<8x64xf32>
    %79 = arith.mulf %78, %77 : vector<8x64xf32>
    %80 = arith.maximumf %77, %79 : vector<8x64xf32>
    %c0_60 = arith.constant 0 : index
    %c0_61 = arith.constant 0 : index
    %81 = vector.load %arg22[%c0_60, %c0_61] : memref<64x32xf32, #tpu.memory_space<vmem>>, vector<64x32xf32>
    %c0_62 = arith.constant 0 : index
    %c0_63 = arith.constant 0 : index
    %82 = vector.load %arg23[%c0_62, %c0_63] : memref<1x32xf32, #tpu.memory_space<vmem>>, vector<1x32xf32>
    %cst_64 = arith.constant dense<0.000000e+00> : vector<8x32xf32>
    %83 = tpu.matmul %80, %81, %cst_64 {dimension_numbers = #tpu.dot_dimension_numbers<[1], [0], [0], [1], [0, 0, 1, 1], [], []>} : vector<8x64xf32>, vector<64x32xf32>, vector<8x32xf32> -> vector<8x32xf32>
    %84 = vector.broadcast %82 : vector<1x32xf32> to vector<8x32xf32>
    %85 = arith.addf %83, %84 : vector<8x32xf32>
    %cst_65 = arith.constant 0.00999999977 : f32
    %86 = vector.broadcast %cst_65 : f32 to vector<8x32xf32>
    %87 = arith.mulf %86, %85 : vector<8x32xf32>
    %88 = arith.maximumf %85, %87 : vector<8x32xf32>
    %c0_66 = arith.constant 0 : index
    %c0_67 = arith.constant 0 : index
    %89 = vector.load %arg24[%c0_66, %c0_67] : memref<32x4xf32, #tpu.memory_space<vmem>>, vector<32x4xf32>
    %c0_68 = arith.constant 0 : index
    %c0_69 = arith.constant 0 : index
    %90 = vector.load %arg25[%c0_68, %c0_69] : memref<1x4xf32, #tpu.memory_space<vmem>>, vector<1x4xf32>
    %cst_70 = arith.constant dense<0.000000e+00> : vector<8x4xf32>
    %91 = tpu.matmul %88, %89, %cst_70 {dimension_numbers = #tpu.dot_dimension_numbers<[1], [0], [0], [1], [0, 0, 1, 1], [], []>} : vector<8x32xf32>, vector<32x4xf32>, vector<8x4xf32> -> vector<8x4xf32>
    %92 = vector.broadcast %90 : vector<1x4xf32> to vector<8x4xf32>
    %93 = arith.addf %91, %92 : vector<8x4xf32>
    %cst_71 = arith.constant 0.00999999977 : f32
    %94 = vector.broadcast %cst_71 : f32 to vector<8x4xf32>
    %95 = arith.mulf %94, %93 : vector<8x4xf32>
    %96 = arith.maximumf %93, %95 : vector<8x4xf32>
    %c0_72 = arith.constant 0 : index
    %c0_73 = arith.constant 0 : index
    %97 = vector.load %arg26[%c0_72, %c0_73] : memref<8x4xf32, #tpu.memory_space<vmem>>, vector<8x4xf32>
    tpu.vector_store %arg26[%c0_72, %c0_73], %96 {strides = array<i32>} : memref<8x4xf32, #tpu.memory_space<vmem>>, vector<8x4xf32>,
    return
  }
  func.func @transform_0(%arg0: i32) -> (i32, i32) {
    %c0_i32 = arith.constant 0 : i32
    %c0_i32_0 = arith.constant 0 : i32
    return %arg0, %c0_i32 : i32, i32
  }
  func.func @transform_1(%arg0: i32) -> (i32, i32) {
    %c0_i32 = arith.constant 0 : i32
    %c0_i32_0 = arith.constant 0 : i32
    %c0_i32_1 = arith.constant 0 : i32
    return %c0_i32, %c0_i32_0 : i32, i32
  }
  func.func @transform_2(%arg0: i32) -> (i32, i32) {
    %c0_i32 = arith.constant 0 : i32
    %c0_i32_0 = arith.constant 0 : i32
    %c0_i32_1 = arith.constant 0 : i32
    return %c0_i32, %c0_i32_0 : i32, i32
  }
  func.func @transform_3(%arg0: i32) -> (i32, i32) {
    %c0_i32 = arith.constant 0 : i32
    %c0_i32_0 = arith.constant 0 : i32
    %c0_i32_1 = arith.constant 0 : i32
    return %c0_i32, %c0_i32_0 : i32, i32
  }
  func.func @transform_4(%arg0: i32) -> (i32, i32) {
    %c0_i32 = arith.constant 0 : i32
    %c0_i32_0 = arith.constant 0 : i32
    %c0_i32_1 = arith.constant 0 : i32
    return %c0_i32, %c0_i32_0 : i32, i32
  }
  func.func @transform_5(%arg0: i32) -> (i32, i32) {
    %c0_i32 = arith.constant 0 : i32
    %c0_i32_0 = arith.constant 0 : i32
    %c0_i32_1 = arith.constant 0 : i32
    return %c0_i32, %c0_i32_0 : i32, i32
  }
  func.func @transform_6(%arg0: i32) -> (i32, i32) {
    %c0_i32 = arith.constant 0 : i32
    %c0_i32_0 = arith.constant 0 : i32
    %c0_i32_1 = arith.constant 0 : i32
    return %c0_i32, %c0_i32_0 : i32, i32
  }
  func.func @transform_7(%arg0: i32) -> (i32, i32) {
    %c0_i32 = arith.constant 0 : i32
    %c0_i32_0 = arith.constant 0 : i32
    %c0_i32_1 = arith.constant 0 : i32
    return %c0_i32, %c0_i32_0 : i32, i32
  }
  func.func @transform_8(%arg0: i32) -> (i32, i32) {
    %c0_i32 = arith.constant 0 : i32
    %c0_i32_0 = arith.constant 0 : i32
    %c0_i32_1 = arith.constant 0 : i32
    return %c0_i32, %c0_i32_0 : i32, i32
  }
  func.func @transform_9(%arg0: i32) -> (i32, i32) {
    %c0_i32 = arith.constant 0 : i32
    %c0_i32_0 = arith.constant 0 : i32
    %c0_i32_1 = arith.constant 0 : i32
    return %c0_i32, %c0_i32_0 : i32, i32
  }
  func.func @transform_10(%arg0: i32) -> (i32, i32) {
    %c0_i32 = arith.constant 0 : i32
    %c0_i32_0 = arith.constant 0 : i32
    %c0_i32_1 = arith.constant 0 : i32
    return %c0_i32, %c0_i32_0 : i32, i32
  }
  func.func @transform_11(%arg0: i32) -> (i32, i32) {
    %c0_i32 = arith.constant 0 : i32
    %c0_i32_0 = arith.constant 0 : i32
    %c0_i32_1 = arith.constant 0 : i32
    return %c0_i32, %c0_i32_0 : i32, i32
  }
  func.func @transform_12(%arg0: i32) -> (i32, i32) {
    %c0_i32 = arith.constant 0 : i32
    %c0_i32_0 = arith.constant 0 : i32
    %c0_i32_1 = arith.constant 0 : i32
    return %c0_i32, %c0_i32_0 : i32, i32
  }
  func.func @transform_13(%arg0: i32) -> (i32, i32) {
    %c0_i32 = arith.constant 0 : i32
    %c0_i32_0 = arith.constant 0 : i32
    %c0_i32_1 = arith.constant 0 : i32
    return %c0_i32, %c0_i32_0 : i32, i32
  }
  func.func @transform_14(%arg0: i32) -> (i32, i32) {
    %c0_i32 = arith.constant 0 : i32
    %c0_i32_0 = arith.constant 0 : i32
    %c0_i32_1 = arith.constant 0 : i32
    return %c0_i32, %c0_i32_0 : i32, i32
  }
  func.func @transform_15(%arg0: i32) -> (i32, i32) {
    %c0_i32 = arith.constant 0 : i32
    %c0_i32_0 = arith.constant 0 : i32
    %c0_i32_1 = arith.constant 0 : i32
    return %c0_i32, %c0_i32_0 : i32, i32
  }
  func.func @transform_16(%arg0: i32) -> (i32, i32) {
    %c0_i32 = arith.constant 0 : i32
    %c0_i32_0 = arith.constant 0 : i32
    %c0_i32_1 = arith.constant 0 : i32
    return %c0_i32, %c0_i32_0 : i32, i32
  }
  func.func @transform_17(%arg0: i32) -> (i32, i32) {
    %c0_i32 = arith.constant 0 : i32
    %c0_i32_0 = arith.constant 0 : i32
    %c0_i32_1 = arith.constant 0 : i32
    return %c0_i32, %c0_i32_0 : i32, i32
  }
  func.func @transform_18(%arg0: i32) -> (i32, i32) {
    %c0_i32 = arith.constant 0 : i32
    %c0_i32_0 = arith.constant 0 : i32
    %c0_i32_1 = arith.constant 0 : i32
    return %c0_i32, %c0_i32_0 : i32, i32
  }
  func.func @transform_19(%arg0: i32) -> (i32, i32) {
    %c0_i32 = arith.constant 0 : i32
    %c0_i32_0 = arith.constant 0 : i32
    %c0_i32_1 = arith.constant 0 : i32
    return %c0_i32, %c0_i32_0 : i32, i32
  }
  func.func @transform_20(%arg0: i32) -> (i32, i32) {
    %c0_i32 = arith.constant 0 : i32
    %c0_i32_0 = arith.constant 0 : i32
    %c0_i32_1 = arith.constant 0 : i32
    return %c0_i32, %c0_i32_0 : i32, i32
  }
  func.func @transform_21(%arg0: i32) -> (i32, i32) {
    %c0_i32 = arith.constant 0 : i32
    %c0_i32_0 = arith.constant 0 : i32
    %c0_i32_1 = arith.constant 0 : i32
    return %c0_i32, %c0_i32_0 : i32, i32
  }
  func.func @transform_22(%arg0: i32) -> (i32, i32) {
    %c0_i32 = arith.constant 0 : i32
    %c0_i32_0 = arith.constant 0 : i32
    %c0_i32_1 = arith.constant 0 : i32
    return %c0_i32, %c0_i32_0 : i32, i32
  }
  func.func @transform_23(%arg0: i32) -> (i32, i32) {
    %c0_i32 = arith.constant 0 : i32
    %c0_i32_0 = arith.constant 0 : i32
    %c0_i32_1 = arith.constant 0 : i32
    return %c0_i32, %c0_i32_0 : i32, i32
  }
  func.func @transform_24(%arg0: i32) -> (i32, i32) {
    %c0_i32 = arith.constant 0 : i32
    %c0_i32_0 = arith.constant 0 : i32
    %c0_i32_1 = arith.constant 0 : i32
    return %c0_i32, %c0_i32_0 : i32, i32
  }
  func.func @transform_25(%arg0: i32) -> (i32, i32) {
    %c0_i32 = arith.constant 0 : i32
    %c0_i32_0 = arith.constant 0 : i32
    return %arg0, %c0_i32 : i32, i32
  }
}

</mosaic_0001>

<bundles_post_ra>
// kernel: tpu_custom_call.1
= control target key start
LH: loop header
LB: loop body
LE: loop exit
PB: predicated region body
PF: predicated region fallthrough
CT: control target
= control target key end

     0   :  { %s3311_s0 = inlined_call_operand.vmem [shape: f32[8,4], index: 0, kind: input, shape index: {}]   ;;  %s3312_s1 = inlined_call_operand.hbm [shape: f32[4,8], index: 1, kind: input, shape index: {}]   ;;  %s3313_s2 = inlined_call_operand.hbm [shape: f32[1,8], index: 2, kind: input, shape index: {}]   ;;  %s3314_s3 = inlined_call_operand.hbm [shape: f32[8,16], index: 3, kind: input, shape index: {}]   ;;  %s3315_s4 = inlined_call_operand.hbm [shape: f32[1,16], index: 4, kind: input, shape index: {}]   ;;  %s3316_s5 = inlined_call_operand.hbm [shape: f32[16,32], index: 5, kind: input, shape index: {}]   ;;  %s3317_s6 = inlined_call_operand.hbm [shape: f32[1,32], index: 6, kind: input, shape index: {}]   ;;  %s3318_s7 = inlined_call_operand.vmem [shape: f32[32,64], index: 7, kind: input, shape index: {}]   ;;  %s3319_s8 = inlined_call_operand.hbm [shape: f32[1,64], index: 8, kind: input, shape index: {}]   ;;  %s3320_s9 = inlined_call_operand.hbm [shape: f32[64,128], index: 9, kind: input, shape index: {}]   ;;  %s3321_s10 = inlined_call_operand.hbm [shape: f32[1,128], index: 10, kind: input, shape index: {}]   ;;  %s3322_s11 = inlined_call_operand.vmem [shape: f32[128,256], index: 11, kind: input, shape index: {}]   ;;  %s3323_s12 = inlined_call_operand.hbm [shape: f32[1,256], index: 12, kind: input, shape index: {}]   ;;  %s3324_s13 = inlined_call_operand.hbm [shape: f32[256,512], index: 13, kind: input, shape index: {}]   ;;  %s3325_s14 = inlined_call_operand.vmem [shape: f32[1,512], index: 14, kind: input, shape index: {}]   ;;  %s3326_s15 = inlined_call_operand.hbm [shape: f32[512,256], index: 15, kind: input, shape index: {}]   ;;  %s3327_s16 = inlined_call_operand.vmem [shape: f32[1,256], index: 16, kind: input, shape index: {}]   ;;  %s3328_s17 = inlined_call_operand.hbm [shape: f32[256,128], index: 17, kind: input, shape index: {}]   ;;  %s3329_s18 = inlined_call_operand.vmem [shape: f32[1,128], index: 18, kind: input, shape index: {}]   ;;  %s3330_s19 = inlined_call_operand.vmem [shape: f32[128,64], index: 19, kind: input, shape index: {}]   ;;  %s3331_s20 = inlined_call_operand.vmem [shape: f32[1,64], index: 20, kind: input, shape index: {}]   ;;  %s3332_s21 = inlined_call_operand.vmem [shape: f32[64,32], index: 21, kind: input, shape index: {}]   ;;  %s3333_s22 = inlined_call_operand.vmem [shape: f32[1,32], index: 22, kind: input, shape index: {}]   ;;  %s3334_s23 = inlined_call_operand.vmem [shape: f32[32,4], index: 23, kind: input, shape index: {}]   ;;  %s3335_s24 = inlined_call_operand.vmem [shape: f32[1,4], index: 24, kind: input, shape index: {}]   ;;  %s3336_s25 = inlined_call_operand.vmem [shape: f32[8,4], index: 25, kind: output, shape index: {}]  }
   0x1   :  { %3350 = sst [smem:[#allocation29_spill]] %s3311_s0 }
   0x2   :  { %3351 = sst [smem:[#allocation30_spill]] %s3312_s1 }
   0x3   :  { %3352 = sst [smem:[#allocation31_spill]] %s3313_s2 }
   0x4   :  { %3353 = sst [smem:[#allocation32_spill]] %s3314_s3 }
   0x5   :  { %3354 = sst [smem:[#allocation33_spill]] %s3315_s4 }
   0x6   :  { %3355 = sst [smem:[#allocation34_spill]] %s3316_s5 }
   0x7   :  { %3356 = sst [smem:[#allocation35_spill]] %s3317_s6 }
   0x8   :  { %3357 = sst [smem:[#allocation36_spill]] %s3318_s7 }
   0x9   :  { %3358 = sst [smem:[#allocation37_spill]] %s3319_s8 }
   0xa   :  { %3359 = sst [smem:[#allocation38_spill]] %s3320_s9 }
   0xb   :  { %3360 = sst [smem:[#allocation39_spill]] %s3336_s25 }
   0xc   :  { %30 = vsyncpa [#allocation3], 0 }
   0xd   :  { %31 = vsyncpa [#allocation5], 0 }
   0xe   :  { %32 = vsyncpa [#allocation8], 0 }
   0xf   :  { %33 = vsyncpa [#allocation11], 0 }
  0x10   :  { %34 = vsyncpa [#allocation14], 0 }
  0x11   :  { %35 = vsyncpa [#allocation17], 0 }
  0x12   :  { %36 = vsyncpa [#allocation20], 0  ;;  %s2700_s29 = smov [#allocation4]   ;;  %s2701_s6 = smov [#allocation7]  }
  0x13   :  { %s55_s2 = sshll.u32 %s2700_s29, 4  ;;  %s75_s30 = sshll.u32 %s2701_s6, 4  ;;  %s56_s2 = int_to_ptr.vmem [resolvable:$true] %s55_s2  ;;  %s76_s30 = int_to_ptr.vmem [resolvable:$true] %s75_s30 }
  0x14   :  { %s3361_s26 = sld [smem:[#allocation31_spill]] }
  0x1a   :  { %s2400_s1 = scalar_lea.hbm %s3361_s26, 16 }
  0x1b   :  { %p2401_p0 = scmp.ne.s32.totalorder %s3361_s26, %s2400_s1  ;;  %p2404_p1 = scmp.lt.u32.totalorder %s2400_s1, %s3361_s26 }
  0x1d   :  { %p2406_p2 = pnand %p2404_p1, %p2401_p0 }
  0x1f   :  { %2409 = shalt.err (!%p2406_p2)
}
  0x20   :  { %s2410_s9 = scalar_lea.vmem %s56_s2, 16  ;;  %s2414_s5 = scalar_lea.vmem %s56_s2, 32 }
  0x21   :  { %p2411_p3 = scmp.ne.s32.totalorder %s56_s2, %s2410_s9  ;;  %p2415_p4 = scmp.lt.s32.totalorder %s56_s2, %s56_s2 }
  0x22   :  { %p2416_p5 = scmp.lt.s32.totalorder %s2414_s5, %s2410_s9 }
  0x24   :  { %p2417_p6 = por %p2416_p5, %p2415_p4 }
  0x26   :  { %p2418_p7 = pnand %p2417_p6, %p2411_p3 }
  0x28   :  { %2421 = shalt.err (!%p2418_p7)
}
  0x29   :  { %58 = dma.hbm_to_vmem [thread:$0]  %s3361_s26, 16, %s56_s2, [#allocation5]  }
  0x2a   :  { %s3362_s3 = sld [smem:[#allocation33_spill]] }
  0x30   :  { %s2422_s8 = scalar_lea.hbm %s3362_s3, 16 }
  0x31   :  { %p2423_p8 = scmp.ne.s32.totalorder %s3362_s3, %s2422_s8  ;;  %p2426_p9 = scmp.lt.u32.totalorder %s2422_s8, %s3362_s3 }
  0x33   :  { %p2428_p10 = pnand %p2426_p9, %p2423_p8 }
  0x35   :  { %2431 = shalt.err (!%p2428_p10)
}
  0x36   :  { %s2432_s9 = scalar_lea.vmem %s76_s30, 16  ;;  %s2436_s5 = scalar_lea.vmem %s76_s30, 32 }
  0x37   :  { %p2433_p11 = scmp.ne.s32.totalorder %s76_s30, %s2432_s9  ;;  %p2437_p12 = scmp.lt.s32.totalorder %s76_s30, %s76_s30 }
  0x38   :  { %p2438_p13 = scmp.lt.s32.totalorder %s2436_s5, %s2432_s9 }
  0x3a   :  { %p2439_p0 = por %p2438_p13, %p2437_p12 }
  0x3c   :  { %p2440_p1 = pnand %p2439_p0, %p2433_p11 }
  0x3e   :  { %2443 = shalt.err (!%p2440_p1)
}
  0x3f   :  { %78 = dma.hbm_to_vmem [thread:$0]  %s3362_s3, 16, %s76_s30, [#allocation8]  }
  0x40   :  { %s2702_s0 = smov [#allocation10]   ;;  %s3363_s8 = sld [smem:[#allocation35_spill]] }
  0x41   :  { %s97_s29 = sshll.u32 %s2702_s0, 4  ;;  %s98_s29 = int_to_ptr.vmem [resolvable:$true] %s97_s29 }
  0x46   :  { %s2444_s27 = scalar_lea.hbm %s3363_s8, 16 }
  0x47   :  { %p2445_p2 = scmp.ne.s32.totalorder %s3363_s8, %s2444_s27  ;;  %p2448_p3 = scmp.lt.u32.totalorder %s2444_s27, %s3363_s8 }
  0x49   :  { %p2450_p4 = pnand %p2448_p3, %p2445_p2 }
  0x4b   :  { %2453 = shalt.err (!%p2450_p4)
}
  0x4c   :  { %s2454_s5 = scalar_lea.vmem %s98_s29, 16  ;;  %s2458_s30 = scalar_lea.vmem %s98_s29, 32 }
  0x4d   :  { %p2455_p5 = scmp.ne.s32.totalorder %s98_s29, %s2454_s5  ;;  %p2459_p6 = scmp.lt.s32.totalorder %s98_s29, %s98_s29 }
  0x4e   :  { %p2460_p7 = scmp.lt.s32.totalorder %s2458_s30, %s2454_s5 }
  0x50   :  { %p2461_p8 = por %p2460_p7, %p2459_p6 }
  0x52   :  { %p2462_p9 = pnand %p2461_p8, %p2455_p5 }
  0x54   :  { %2465 = shalt.err (!%p2462_p9)
}
  0x55   :  { %100 = dma.hbm_to_vmem [thread:$0]  %s3363_s8, 16, %s98_s29, [#allocation11]  }
  0x56   :  { %s2703_s26 = smov [#allocation13]   ;;  %s2704_s6 = smov [#allocation16]  }
  0x57   :  { %s118_s0 = sshll.u32 %s2703_s26, 4  ;;  %s143_s7 = sshll.u32 %s2704_s6, 4  ;;  %s119_s0 = int_to_ptr.vmem [resolvable:$true] %s118_s0  ;;  %s144_s7 = int_to_ptr.vmem [resolvable:$true] %s143_s7 }
  0x58   :  { %s3364_s4 = sld [smem:[#allocation38_spill]] }
  0x5e   :  { %s2466_s28 = scalar_lea.hbm %s3364_s4, 1024 }
  0x5f   :  { %p2467_p10 = scmp.ne.s32.totalorder %s3364_s4, %s2466_s28  ;;  %p2470_p11 = scmp.lt.u32.totalorder %s2466_s28, %s3364_s4 }
  0x61   :  { %p2472_p12 = pnand %p2470_p11, %p2467_p10 }
  0x63   :  { %2475 = shalt.err (!%p2472_p12)
}
  0x64   :  { %s2476_s29 = scalar_lea.vmem %s119_s0, 1024  ;;  %p2481_p0 = scmp.lt.s32.totalorder %s119_s0, %s119_s0 }
  0x65   :  { %p2477_p13 = scmp.ne.s32.totalorder %s119_s0, %s2476_s29  ;;  %p2482_p1 = scmp.lt.s32.totalorder %s2476_s29, %s2476_s29 }
  0x67   :  { %p2483_p2 = por %p2482_p1, %p2481_p0 }
  0x69   :  { %p2484_p3 = pnand %p2483_p2, %p2477_p13 }
  0x6b   :  { %2487 = shalt.err (!%p2484_p3)
}
  0x6c   :  { %s3346_s8 = smov 128   ;;  %s3348_s3 = smov 8  }
  0x6d   :  { %124 = dma.hbm_to_vmem [thread:$0]  %s3364_s4, 1024, %s119_s0, [#allocation14], %s3346_s8, %s3346_s8, %s3348_s3  }
  0x6e   :  { %s2488_s27 = scalar_lea.hbm %s3323_s12, 32 }
  0x6f   :  { %p2489_p4 = scmp.ne.s32.totalorder %s3323_s12, %s2488_s27  ;;  %p2492_p5 = scmp.lt.u32.totalorder %s2488_s27, %s3323_s12 }
  0x71   :  { %p2494_p6 = pnand %p2492_p5, %p2489_p4 }
  0x73   :  { %2497 = shalt.err (!%p2494_p6)
}
  0x74   :  { %s2498_s30 = scalar_lea.vmem %s144_s7, 32  ;;  %p2503_p8 = scmp.lt.s32.totalorder %s144_s7, %s144_s7 }
  0x75   :  { %p2499_p7 = scmp.ne.s32.totalorder %s144_s7, %s2498_s30  ;;  %p2504_p9 = scmp.lt.s32.totalorder %s2498_s30, %s2498_s30 }
  0x77   :  { %p2505_p10 = por %p2504_p9, %p2503_p8 }
  0x79   :  { %p2506_p11 = pnand %p2505_p10, %p2499_p7 }
  0x7b   :  { %2509 = shalt.err (!%p2506_p11)
}
  0x7c   :  { %146 = dma.hbm_to_vmem [thread:$0]  %s3323_s12, 32, %s144_s7, [#allocation17]  }
  0x7d   :  { %s2707_s29 = smov [#allocation19]   ;;  %s2510_s6 = scalar_lea.hbm %s3326_s15, 16384 }
  0x7e   :  { %s166_s25 = sshll.u32 %s2707_s29, 4  ;;  %p2511_p12 = scmp.ne.s32.totalorder %s3326_s15, %s2510_s6  ;;  %s167_s25 = int_to_ptr.vmem [resolvable:$true] %s166_s25 }
  0x7f   :  { %p2514_p13 = scmp.lt.u32.totalorder %s2510_s6, %s3326_s15 }
  0x81   :  { %p2516_p0 = pnand %p2514_p13, %p2511_p12 }
  0x83   :  { %2519 = shalt.err (!%p2516_p0)
}
  0x84   :  { %s2520_s5 = scalar_lea.vmem %s167_s25, 16384  ;;  %p2525_p2 = scmp.lt.s32.totalorder %s167_s25, %s167_s25 }
  0x85   :  { %p2521_p1 = scmp.ne.s32.totalorder %s167_s25, %s2520_s5  ;;  %p2526_p3 = scmp.lt.s32.totalorder %s2520_s5, %s2520_s5 }
  0x87   :  { %p2527_p4 = por %p2526_p3, %p2525_p2 }
  0x89   :  { %p2528_p5 = pnand %p2527_p4, %p2521_p1 }
  0x8b   :  { %2531 = shalt.err (!%p2528_p5)
}
  0x8c   :  { %s2708_s12 = smov 256   ;;  %s2709_s7 = smov 16  }
  0x8d   :  { %172 = dma.hbm_to_vmem [thread:$0]  %s3326_s15, 16384, %s167_s25, [#allocation20], %s2708_s12, %s2708_s12, %s2709_s7  }
  0x8e   :  { %s2710_s4 = smov [#allocation2]   ;;  %s2711_s2 = smov [#allocation6]  }
  0x8f   :  { %s45_s29 = sshll.u32 %s2710_s4, 4  ;;  %s65_s26 = sshll.u32 %s2711_s2, 4  ;;  %s46_s29 = int_to_ptr.vmem [resolvable:$true] %s45_s29  ;;  %s66_s26 = int_to_ptr.vmem [resolvable:$true] %s65_s26 }
  0x90   :  { %s3365_s1 = sld [smem:[#allocation30_spill]] }
  0x96   :  { %s2532_s28 = scalar_lea.hbm %s3365_s1, 64 }
  0x97   :  { %p2533_p6 = scmp.ne.s32.totalorder %s3365_s1, %s2532_s28  ;;  %p2536_p7 = scmp.lt.u32.totalorder %s2532_s28, %s3365_s1 }
  0x99   :  { %p2538_p8 = pnand %p2536_p7, %p2533_p6 }
  0x9b   :  { %2541 = shalt.err (!%p2538_p8)
}
  0x9c   :  { %s2542_s15 = scalar_lea.vmem %s46_s29, 64  ;;  %p2547_p10 = scmp.lt.s32.totalorder %s46_s29, %s46_s29 }
  0x9d   :  { %p2543_p9 = scmp.ne.s32.totalorder %s46_s29, %s2542_s15  ;;  %p2548_p11 = scmp.lt.s32.totalorder %s2542_s15, %s2542_s15 }
  0x9f   :  { %p2549_p12 = por %p2548_p11, %p2547_p10 }
  0xa1   :  { %p2550_p13 = pnand %p2549_p12, %p2543_p9 }
  0xa3   :  { %2553 = shalt.err (!%p2550_p13)
}
  0xa4   :  { %48 = dma.hbm_to_vmem [thread:$0]  %s3365_s1, 64, %s46_s29, [#allocation3]  }
  0xa5   :  { %s3366_s0 = sld [smem:[#allocation32_spill]] }
  0xab   :  { %s2554_s4 = scalar_lea.hbm %s3366_s0, 128 }
  0xac   :  { %p2555_p0 = scmp.ne.s32.totalorder %s3366_s0, %s2554_s4  ;;  %p2558_p1 = scmp.lt.u32.totalorder %s2554_s4, %s3366_s0 }
  0xae   :  { %p2560_p2 = pnand %p2558_p1, %p2555_p0 }
  0xb0   :  { %2563 = shalt.err (!%p2560_p2)
}
  0xb1   :  { %s2564_s27 = scalar_lea.vmem %s66_s26, 128  ;;  %p2569_p4 = scmp.lt.s32.totalorder %s66_s26, %s66_s26 }
  0xb2   :  { %p2565_p3 = scmp.ne.s32.totalorder %s66_s26, %s2564_s27  ;;  %p2570_p5 = scmp.lt.s32.totalorder %s2564_s27, %s2564_s27 }
  0xb4   :  { %p2571_p6 = por %p2570_p5, %p2569_p4 }
  0xb6   :  { %p2572_p7 = pnand %p2571_p6, %p2565_p3 }
  0xb8   :  { %2575 = shalt.err (!%p2572_p7)
}
  0xb9   :  { %68 = dma.hbm_to_vmem [thread:$0]  %s3366_s0, 128, %s66_s26, [#allocation5]  }
  0xba   :  { %s2712_s28 = smov [#allocation9]   ;;  %s2713_s5 = smov [#allocation12]  }
  0xbb   :  { %s84_s9 = sshll.u32 %s2712_s28, 4  ;;  %s109_s15 = sshll.u32 %s2713_s5, 4  ;;  %s85_s9 = int_to_ptr.vmem [resolvable:$true] %s84_s9  ;;  %s110_s15 = int_to_ptr.vmem [resolvable:$true] %s109_s15 }
  0xbc   :  { %s3367_s7 = sld [smem:[#allocation34_spill]] }
  0xc2   :  { %s2576_s30 = scalar_lea.hbm %s3367_s7, 256 }
  0xc3   :  { %p2577_p8 = scmp.ne.s32.totalorder %s3367_s7, %s2576_s30  ;;  %p2580_p9 = scmp.lt.u32.totalorder %s2576_s30, %s3367_s7 }
  0xc5   :  { %p2582_p10 = pnand %p2580_p9, %p2577_p8 }
  0xc7   :  { %2585 = shalt.err (!%p2582_p10)
}
  0xc8   :  { %s2586_s26 = scalar_lea.vmem %s85_s9, 256  ;;  %p2591_p12 = scmp.lt.s32.totalorder %s85_s9, %s85_s9 }
  0xc9   :  { %p2587_p11 = scmp.ne.s32.totalorder %s85_s9, %s2586_s26  ;;  %p2592_p13 = scmp.lt.s32.totalorder %s2586_s26, %s2586_s26 }
  0xcb   :  { %p2593_p0 = por %p2592_p13, %p2591_p12 }
  0xcd   :  { %p2594_p1 = pnand %p2593_p0, %p2587_p11 }
  0xcf   :  { %2597 = shalt.err (!%p2594_p1)
}
  0xd0   :  { %s3368_s0 = smov 8   ;;  %s3369_s6 = smov 128  }
  0xd1   :  { %90 = dma.hbm_to_vmem [thread:$0]  %s3367_s7, 256, %s85_s9, [#allocation8], %s3369_s6, %s3369_s6, %s3368_s0  }
  0xd2   :  { %s3370_s5 = sld [smem:[#allocation37_spill]] }
  0xd8   :  { %s2598_s25 = scalar_lea.hbm %s3370_s5, 16 }
  0xd9   :  { %p2599_p2 = scmp.ne.s32.totalorder %s3370_s5, %s2598_s25  ;;  %p2602_p3 = scmp.lt.u32.totalorder %s2598_s25, %s3370_s5 }
  0xdb   :  { %p2604_p4 = pnand %p2602_p3, %p2599_p2 }
  0xdd   :  { %2607 = shalt.err (!%p2604_p4)
}
  0xde   :  { %s2608_s8 = scalar_lea.vmem %s110_s15, 16  ;;  %s2612_s3 = scalar_lea.vmem %s110_s15, 32 }
  0xdf   :  { %p2609_p5 = scmp.ne.s32.totalorder %s110_s15, %s2608_s8  ;;  %p2613_p6 = scmp.lt.s32.totalorder %s110_s15, %s110_s15 }
  0xe0   :  { %p2614_p7 = scmp.lt.s32.totalorder %s2612_s3, %s2608_s8 }
  0xe2   :  { %p2615_p8 = por %p2614_p7, %p2613_p6 }
  0xe4   :  { %p2616_p9 = pnand %p2615_p8, %p2609_p5 }
  0xe6   :  { %2619 = shalt.err (!%p2616_p9)
}
  0xe7   :  { %112 = dma.hbm_to_vmem [thread:$0]  %s3370_s5, 16, %s110_s15, [#allocation11]  }
  0xe8   :  { %s2714_s26 = smov [#allocation15]   ;;  %s2715_s29 = smov [#allocation18]  }
  0xe9   :  { %s131_s27 = sshll.u32 %s2714_s26, 4  ;;  %s152_s1 = sshll.u32 %s2715_s29, 4  ;;  %s132_s27 = int_to_ptr.vmem [resolvable:$true] %s131_s27  ;;  %s2978_s1 = int_to_ptr.vmem [resolvable:$true] %s152_s1 }
  0xea   :  { %s2620_s12 = scalar_lea.hbm %s3321_s10, 16 }
  0xeb   :  { %p2621_p10 = scmp.ne.s32.totalorder %s3321_s10, %s2620_s12  ;;  %p2624_p11 = scmp.lt.u32.totalorder %s2620_s12, %s3321_s10 }
  0xed   :  { %p2626_p12 = pnand %p2624_p11, %p2621_p10 }
  0xef   :  { %2629 = shalt.err (!%p2626_p12)
}
  0xf0   :  { %s2630_s15 = scalar_lea.vmem %s132_s27, 16  ;;  %s2634_s5 = scalar_lea.vmem %s132_s27, 32 }
  0xf1   :  { %p2631_p13 = scmp.ne.s32.totalorder %s132_s27, %s2630_s15  ;;  %p2635_p0 = scmp.lt.s32.totalorder %s132_s27, %s132_s27 }
  0xf2   :  { %p2636_p1 = scmp.lt.s32.totalorder %s2634_s5, %s2630_s15 }
  0xf4   :  { %p2637_p2 = por %p2636_p1, %p2635_p0 }
  0xf6   :  { %p2638_p3 = pnand %p2637_p2, %p2631_p13 }
  0xf8   :  { %2641 = shalt.err (!%p2638_p3)
}
  0xf9   :  { %134 = dma.hbm_to_vmem [thread:$0]  %s3321_s10, 16, %s132_s27, [#allocation14]  }
  0xfa   :  { %s2642_s29 = scalar_lea.hbm %s3324_s13, 16384 }
  0xfb   :  { %p2643_p4 = scmp.ne.s32.totalorder %s3324_s13, %s2642_s29  ;;  %p2646_p5 = scmp.lt.u32.totalorder %s2642_s29, %s3324_s13 }
  0xfd   :  { %p2648_p6 = pnand %p2646_p5, %p2643_p4 }
  0xff   :  { %2651 = shalt.err (!%p2648_p6)
}
 0x100   :  { %s2652_s4 = scalar_lea.vmem %s2978_s1, 16384  ;;  %p2657_p8 = scmp.lt.s32.totalorder %s2978_s1, %s2978_s1 }
 0x101   :  { %p2653_p7 = scmp.ne.s32.totalorder %s2978_s1, %s2652_s4  ;;  %p2658_p9 = scmp.lt.s32.totalorder %s2652_s4, %s2652_s4 }
 0x103   :  { %p2659_p10 = por %p2658_p9, %p2657_p8 }
 0x105   :  { %p2660_p11 = pnand %p2659_p10, %p2653_p7 }
 0x107   :  { %2663 = shalt.err (!%p2660_p11)
}
 0x108   :  { %s2716_s10 = smov 512   ;;  %s2717_s27 = smov 32  }
 0x109   :  { %158 = dma.hbm_to_vmem [thread:$0]  %s3324_s13, 16384, %s2978_s1, [#allocation17], %s2716_s10, %s2716_s10, %s2717_s27  }
 0x10a   :  { %s2718_s15 = smov [#allocation21]   ;;  %s2664_s7 = scalar_lea.hbm %s3328_s17, 4096 }
 0x10b   :  { %s180_s5 = sshll.u32 %s2718_s15, 4  ;;  %p2665_p12 = scmp.ne.s32.totalorder %s3328_s17, %s2664_s7  ;;  %s181_s5 = int_to_ptr.vmem [resolvable:$true] %s180_s5 }
 0x10c   :  { %p2668_p13 = scmp.lt.u32.totalorder %s2664_s7, %s3328_s17 }
 0x10e   :  { %p2670_p0 = pnand %p2668_p13, %p2665_p12 }
 0x110   :  { %2673 = shalt.err (!%p2670_p0)
}
 0x111   :  { %s2674_s12 = scalar_lea.vmem %s181_s5, 4096  ;;  %p2679_p2 = scmp.lt.s32.totalorder %s181_s5, %s181_s5 }
 0x112   :  { %p2675_p1 = scmp.ne.s32.totalorder %s181_s5, %s2674_s12  ;;  %p2680_p3 = scmp.lt.s32.totalorder %s2674_s12, %s2674_s12 }
 0x114   :  { %p2681_p4 = por %p2680_p3, %p2679_p2 }
 0x116   :  { %p2682_p5 = pnand %p2681_p4, %p2675_p1 }
 0x118   :  { %2685 = shalt.err (!%p2682_p5)
}
 0x119   :  { %186 = dma.hbm_to_vmem [thread:$0]  %s3328_s17, 4096, %s181_s5, [#allocation20], %s3369_s6, %s3369_s6, %s3368_s0  }
 0x11a   :  { %2686 = dma.done.wait [#allocation3], 64  }
 0x11b   :  { %2687 = vsyncadd [#allocation3], 4294967232 }
 0x11c   :  { %2688 = dma.done.wait [#allocation5], 144  }
 0x11d   :  { %2689 = vsyncadd [#allocation5], 4294967152 }
 0x11e   :  { %2690 = dma.done.wait [#allocation8], 272  }
 0x11f   :  { %2691 = vsyncadd [#allocation8], 4294967024 }
 0x120   :  { %2692 = dma.done.wait [#allocation11], 32  }
 0x121   :  { %2693 = vsyncadd [#allocation11], 4294967264 }
 0x122   :  { %2694 = dma.done.wait [#allocation14], 1040  }
 0x123   :  { %2695 = vsyncadd [#allocation14], 4294966256 }
 0x124   :  { %2696 = dma.done.wait [#allocation17], 16416  }
 0x125   :  { %2697 = vsyncadd [#allocation17], 4294950880 }
 0x126   :  { %2698 = dma.done.wait [#allocation20], 20480  }
 0x127   :  { %2699 = vsyncadd [#allocation20], 4294946816  ;;  %v2719_v0 = vmov 0.0   ;;  %vm2720_vm0 = vmmov 0   ;;  %vm253_vm1 = vcmask 1043456   ;;  %vm249_vm2 = vcmask 31744  }
 0x128   :  { %1879 = vmatprep.subr.mxu1 %v2719_v0  ;;  %1881 = vmatprep.mubr.msk.f32.mxu1 %vm2720_vm0, %v2719_v0  ;;  %v241_v1 = vld [vmem:[#allocation2] sm:$0xf]  ;;  %s3371_s6 = sld [smem:[#allocation29_spill]]  ;;  %v329_v3 = vld [vmem:[#allocation6] sm:$0xff]  ;;  %v1775_v4 = vld [vmem:[#allocation4] ss:$0 sm:$0xff] }
 0x129   :  { %1923 = vmatprep.mubr.msk.f32.mxu0 %vm2720_vm0, %v2719_v0  ;;  %1880 = vmatpush3.msk.msra.mxu1 %vm253_vm1, %v241_v1  ;;  %vm337_vm3 = vcmask 64512   ;;  %v413_v10 = vld [vmem:[#allocation9] sm:$0xff]  ;;  %v414_v11 = vld [vmem:[#allocation9 + $0x8] sm:$0xff]  ;;  %v2721_v13 = vmov 0.0|0.0   ;;  %v1778_v14 = vld [vmem:[#allocation7] ss:$0 sm:$0xff] }
 0x12a   :  { %1884 = vmatprep.subr.mxu1 %v2719_v0  ;;  %v1992_v12 = vpack.c.bf16 %v414_v11, %v413_v10  ;;  %2000 = vmatprep.subr.bf16.mxu0 %v2721_v13  ;;  %vm422_vm4 = vcmask 130048   ;;  %s3372_s10 = sld [smem:[#allocation36_spill]]  ;;  %v585_v26 = vld [vmem:[#allocation13] sm:$0xff]  ;;  %v586_v27 = vld [vmem:[#allocation13 + $0x8] sm:$0xff]  ;;  %v587_v28 = vld [vmem:[#allocation13 + $0x10] sm:$0xff]  ;;  %vm509_vm5 = vcmask 261120  }
 0x12b   :  { %v2001_v29 = vpack.c.bf16 %v586_v27, %v585_v26  ;;  %v588_v30 = vld [vmem:[#allocation13 + $0x18] sm:$0xff]  ;;  %v589_v38 = vld [vmem:[#allocation13 + $0x20] sm:$0xff]  ;;  %v590_v39 = vld [vmem:[#allocation13 + $0x28] sm:$0xff]  ;;  %vm600_vm6 = vcmask 523264  }
 0x12c   :  { %v2004_v31 = vpack.c.bf16 %v588_v30, %v587_v28  ;;  %v1780_v32 = vld [vmem:[#allocation10] ss:$0 sm:$0xff]  ;;  %v2007_v40 = vpack.c.bf16 %v590_v39, %v589_v38  ;;  %v591_v41 = vld [vmem:[#allocation13 + $0x30] sm:$0xff]  ;;  %v679_v45 = vld [vmem:[%s3322_s11 + $0x18] sm:$0xff] }
 0x12d   :  { %2002 = vmatpush3.bf16.msra.mxu0 %v2001_v29  ;;  %v592_v42 = vld [vmem:[#allocation13 + $0x38] sm:$0xff]  ;;  %v676_v46 = vld [vmem:[%s3322_s11] sm:$0xff]  ;;  %v683_v50 = vld [vmem:[%s3322_s11 + $0x38] sm:$0xff] }
 0x12e   :  { %v240_v2 = vld [vmem:[%s3371_s6] sm:$0xff]  ;;  %2003 = vmatprep.subr.bf16.mxu0 %v2721_v13  ;;  %v2010_v43 = vpack.c.bf16 %v592_v42, %v591_v41  ;;  %v677_v44 = vld [vmem:[%s3322_s11 + $0x8] sm:$0xff]  ;;  %v678_v48 = vld [vmem:[%s3322_s11 + $0x10] sm:$0xff] }
 0x12f   :  { %1882 = vmatmul.mubr.msk.f32.vlgmr.msra.gmra.mrb[0].mxu1 %vm249_vm2, %v240_v2  ;;  %v2012_v47 = vpack.c.bf16 %v679_v45, %v677_v44  ;;  %v681_v49 = vld [vmem:[%s3322_s11 + $0x28] sm:$0xff]  ;;  %v2014_v51 = vpack.c.bf16 %v678_v48, %v676_v46  ;;  %v680_v53 = vld [vmem:[%s3322_s11 + $0x20] sm:$0xff]  ;;  %v682_v54 = vld [vmem:[%s3322_s11 + $0x30] sm:$0xff] }
 0x130   :  { %1886 = vmatprep.mubr.msk.f32.mxu1 %vm2720_vm0, %v2719_v0  ;;  %1885 = vmatpush3.msra.mxu1 %v329_v3  ;;  %v498_v20 = vld [vmem:[%s3372_s10] sm:$0xff]  ;;  %v499_v21 = vld [vmem:[%s3372_s10 + $0x8] sm:$0xff]  ;;  %v500_v23 = vld [vmem:[%s3372_s10 + $0x10] sm:$0xff]  ;;  %v2016_v52 = vpack.c.bf16 %v683_v50, %v681_v49  ;;  %v2018_v57 = vpack.c.bf16 %v682_v54, %v680_v53 }
 0x131   :  { %1991 = vmatprep.subr.bf16.mxu1 %v2721_v13  ;;  %v1995_v22 = vpack.c.bf16 %v499_v21, %v498_v20  ;;  %v501_v24 = vld [vmem:[%s3372_s10 + $0x18] sm:$0xff]  ;;  %2005 = vmatpush3.bf16.msra.mxu0 %v2004_v31  ;;  %v685_v55 = vld [vmem:[%s3322_s11 + $0x48] sm:$0xff]  ;;  %v684_v59 = vld [vmem:[%s3322_s11 + $0x40] sm:$0xff] }
 0x132   :  { %v1998_v25 = vpack.c.bf16 %v501_v24, %v500_v23  ;;  %2006 = vmatprep.subr.bf16.mxu0 %v2721_v13  ;;  %v687_v56 = vld [vmem:[%s3322_s11 + $0x58] sm:$0xff]  ;;  %v686_v60 = vld [vmem:[%s3322_s11 + $0x50] sm:$0xff]  ;;  %v689_v61 = vld [vmem:[%s3322_s11 + $0x68] sm:$0xff] }
 0x133   :  { %v2020_v58 = vpack.c.bf16 %v687_v56, %v685_v55  ;;  %v691_v62 = vld [vmem:[%s3322_s11 + $0x78] sm:$0xff]  ;;  %v2022_v63 = vpack.c.bf16 %v686_v60, %v684_v59  ;;  %v688_v2 = vld [vmem:[%s3322_s11 + $0x60] sm:$0xff]  ;;  %v690_v3 = vld [vmem:[%s3322_s11 + $0x70] sm:$0xff] }
 0x134   :  { %v2024_v1 = vpack.c.bf16 %v691_v62, %v689_v61  ;;  %v697_v10 = vld [vmem:[%s3322_s11 + $0xa8] sm:$0xff]  ;;  %v699_v11 = vld [vmem:[%s3322_s11 + $0xb8] sm:$0xff]  ;;  %v1782_v21 = vld [vmem:[#allocation12] ss:$0 sm:$0xff] }
 0x135   :  { %2008 = vmatpush3.bf16.msra.mxu0 %v2007_v40  ;;  %v700_v27 = vld [vmem:[%s3322_s11 + $0xc0] sm:$0xff]  ;;  %v702_v28 = vld [vmem:[%s3322_s11 + $0xd0] sm:$0xff]  ;;  %v705_v30 = vld [vmem:[%s3322_s11 + $0xe8] sm:$0xff] }
 0x136   :  { %2009 = vmatprep.subr.bf16.mxu0 %v2721_v13  ;;  %v2038_v29 = vpack.c.bf16 %v702_v28, %v700_v27  ;;  %v707_v31 = vld [vmem:[%s3322_s11 + $0xf8] sm:$0xff]  ;;  %v798_v38 = vld [vmem:[#allocation18 + $0x18] sm:$0xff]  ;;  %v804_v45 = vld [vmem:[#allocation18 + $0x48] sm:$0xff] }
 0x137   :  { %v802_v40 = vld [vmem:[#allocation18 + $0x38] sm:$0xff]  ;;  %v795_v41 = vld [vmem:[#allocation18] sm:$0xff]  ;;  %v808_v46 = vld [vmem:[#allocation18 + $0x68] sm:$0xff] }
 0x138   :  { %v799_v42 = vld [vmem:[#allocation18 + $0x20] sm:$0xff] }
 0x139   :  { %2011 = vmatpush3.bf16.msra.mxu0 %v2010_v43  ;;  %v2108_v43 = vpack.c.bf16 %v802_v40, %v798_v38  ;;  %v2046_v44 = vpack.c.bf16 %v799_v42, %v795_v41  ;;  %v803_v48 = vld [vmem:[#allocation18 + $0x40] sm:$0xff]  ;;  %v880_v38 = vld [vmem:[#allocation18 + $0x2a8] sm:$0xff] }
 0x13a   :  { %v807_v49 = vld [vmem:[#allocation18 + $0x60] sm:$0xff] }
 0x13b   :  { %v2050_v50 = vpack.c.bf16 %v807_v49, %v803_v48  ;;  %v811_v54 = vld [vmem:[#allocation18 + $0x80] sm:$0xff]  ;;  %v892_v49 = vld [vmem:[#allocation18 + $0x308] sm:$0xff] }
 0x13c   :  { %v815_v55 = vld [vmem:[#allocation18 + $0xa0] sm:$0xff] }
 0x13d   :  { %v2054_v56 = vpack.c.bf16 %v815_v55, %v811_v54  ;;  %v819_v60 = vld [vmem:[#allocation18 + $0xc0] sm:$0xff]  ;;  %v900_v55 = vld [vmem:[#allocation18 + $0x348] sm:$0xff] }
 0x13e   :  { %v823_v61 = vld [vmem:[#allocation18 + $0xe0] sm:$0xff] }
 0x13f   :  { %v2058_v62 = vpack.c.bf16 %v823_v61, %v819_v60  ;;  %v859_v28 = vld [vmem:[#allocation18 + $0x200] sm:$0xff]  ;;  %v1784_v61 = vld [vmem:[#allocation15] ss:$0 sm:$0xff] }
 0x140   :  { %v875_v40 = vld [vmem:[#allocation18 + $0x280] sm:$0xff] }
 0x141   :  { %v879_v41 = vld [vmem:[#allocation18 + $0x2a0] sm:$0xff] }
 0x142   :  { %v2086_v42 = vpack.c.bf16 %v879_v41, %v875_v40  ;;  %v845_v41 = vld [vmem:[#allocation18 + $0x190] sm:$0xff] }
 0x202   :  { %v323_v5 = vpop.f32.mrb[0].mxu1 }
 0x203   :  { %v324_v6 = vadd.f32 %v1775_v4, %v323_v5  ;;  %v1883_v7 = vpop.f32.mrb[1].mxu1  ;;  %v693_v4 = vld [vmem:[%s3322_s11 + $0x88] sm:$0xff]  ;;  %v695_v5 = vld [vmem:[%s3322_s11 + $0x98] sm:$0xff] }
 0x204   :  { %v2028_v7 = vpack.c.bf16 %v695_v5, %v693_v4  ;;  %v831_v4 = vld [vmem:[#allocation18 + $0x120] sm:$0xff] }
 0x205   :  { %v327_v8 = vmul.f32 0.01, %v324_v6 }
 0x207   :  { %v328_v9 = vmax.f32 %v324_v6, %v327_v8  ;;  %v2026_v6 = vpack.c.bf16 %v690_v3, %v688_v2  ;;  %v692_v8 = vld [vmem:[%s3322_s11 + $0x80] sm:$0xff]  ;;  %v827_v3 = vld [vmem:[#allocation18 + $0x100] sm:$0xff] }
 0x208   :  { %v2062_v5 = vpack.c.bf16 %v831_v4, %v827_v3  ;;  %v801_v3 = vld [vmem:[#allocation18 + $0x30] sm:$0xff]  ;;  %v806_v4 = vld [vmem:[#allocation18 + $0x58] sm:$0xff] }
 0x209   :  { %1887 = vmatmul.mubr.msk.f32.vlgmr.msra.gmra.mrb[2].mxu1 %vm337_vm3, %v328_v9  ;;  %v694_v9 = vld [vmem:[%s3322_s11 + $0x90] sm:$0xff] }
 0x20a   :  { %1893 = vmatprep.mubr.msk.f32.mxu1 %vm2720_vm0, %v2719_v0  ;;  %1993 = vmatpush3.bf16.msra.mxu1 %v1992_v12  ;;  %v2030_v12 = vpack.c.bf16 %v694_v9, %v692_v8  ;;  %v835_v9 = vld [vmem:[#allocation18 + $0x140] sm:$0xff] }
 0x20b   :  { %1994 = vmatprep.subr.bf16.mxu1 %v2721_v13 }
 0x2dc   :  { %v407_v15 = vpop.f32.mrb[2].mxu1 }
 0x2dd   :  { %v408_v16 = vadd.f32 %v1778_v14, %v407_v15  ;;  %v1888_v17 = vpop.f32.mrb[3].mxu1  ;;  %v2032_v14 = vpack.c.bf16 %v699_v11, %v697_v10  ;;  %v696_v15 = vld [vmem:[%s3322_s11 + $0xa0] sm:$0xff]  ;;  %v839_v10 = vld [vmem:[#allocation18 + $0x160] sm:$0xff] }
 0x2de   :  { %v701_v17 = vld [vmem:[%s3322_s11 + $0xc8] sm:$0xff]  ;;  %v2066_v11 = vpack.c.bf16 %v839_v10, %v835_v9 }
 0x2df   :  { %v411_v18 = vmul.f32 0.01, %v408_v16  ;;  %v805_v10 = vld [vmem:[#allocation18 + $0x50] sm:$0xff] }
 0x2e1   :  { %v412_v19 = vmax.f32 %v408_v16, %v411_v18  ;;  %v698_v16 = vld [vmem:[%s3322_s11 + $0xb0] sm:$0xff]  ;;  %v703_v18 = vld [vmem:[%s3322_s11 + $0xd8] sm:$0xff] }
 0x2e2   :  { %v2036_v20 = vpack.c.bf16 %v703_v18, %v701_v17  ;;  %v847_v17 = vld [vmem:[#allocation18 + $0x1a0] sm:$0xff] }
 0x2e3   :  { %1894 = vmatmul.mubr.msk.f32.vlgmr.msra.gmra.mrb[4].mxu1 %vm422_vm4, %v412_v19  ;;  %v2034_v19 = vpack.c.bf16 %v698_v16, %v696_v15  ;;  %v843_v16 = vld [vmem:[#allocation18 + $0x180] sm:$0xff] }
 0x2e4   :  { %1904 = vmatprep.mubr.msk.f32.mxu1 %vm2720_vm0, %v2719_v0  ;;  %1996 = vmatpush3.bf16.msra.mxu1 %v1995_v22  ;;  %v2070_v18 = vpack.c.bf16 %v847_v17, %v843_v16  ;;  %v813_v17 = vld [vmem:[#allocation18 + $0x90] sm:$0xff] }
 0x2e5   :  { %1997 = vmatprep.subr.bf16.mxu1 %v2721_v13 }
 0x2e8   :  { %1999 = vmatpush3.bf16.msra.mxu1 %v1998_v25 }
 0x2e9   :  { %2013 = vmatprep.subr.bf16.mxu1 %v2012_v47  ;;  %v2048_v47 = vpack.c.bf16 %v808_v46, %v804_v45  ;;  %v883_v46 = vld [vmem:[#allocation18 + $0x2c0] sm:$0xff] }
 0x3b6   :  { %v492_v33 = vpop.f32.mrb[4].mxu1 }
 0x3b7   :  { %v493_v34 = vadd.f32 %v1780_v32, %v492_v33  ;;  %v1895_v35 = vpop.f32.mrb[5].mxu1  ;;  %v2040_v32 = vpack.c.bf16 %v707_v31, %v705_v30  ;;  %v704_v33 = vld [vmem:[%s3322_s11 + $0xe0] sm:$0xff] }
 0x3b8   :  { %v868_v31 = vld [vmem:[#allocation18 + $0x248] sm:$0xff] }
 0x3b9   :  { %v496_v36 = vmul.f32 0.01, %v493_v34 }
 0x3bb   :  { %v497_v37 = vmax.f32 %v493_v34, %v496_v36  ;;  %v706_v34 = vld [vmem:[%s3322_s11 + $0xf0] sm:$0xff]  ;;  %v796_v36 = vld [vmem:[#allocation18 + $0x8] sm:$0xff] }
 0x3bc   :  { %v2042_v35 = vpack.c.bf16 %v706_v34, %v704_v33  ;;  %v867_v34 = vld [vmem:[#allocation18 + $0x240] sm:$0xff] }
 0x3bd   :  { %1905 = vmatmul.mubr.msk.f32.vlgmr.msra.gmra.mrb[6].mxu1 %vm509_vm5, %v497_v37  ;;  %v800_v37 = vld [vmem:[#allocation18 + $0x28] sm:$0xff] }
 0x3be   :  { %784 = vmatprep.mubr.f32.mxu1 %v2719_v0  ;;  %2015 = vmatpush1.bf16.msra.mxu1 %v2014_v51  ;;  %v2044_v39 = vpack.c.bf16 %v800_v37, %v796_v36  ;;  %v812_v51 = vld [vmem:[#allocation18 + $0x88] sm:$0xff] }
 0x3bf   :  { %2017 = vmatprep.subr.bf16.mxu1 %v2016_v52  ;;  %v816_v52 = vld [vmem:[#allocation18 + $0xa8] sm:$0xff] }
 0x3c0   :  { %2045 = vmatprep.subr.bf16.mxu0 %v2044_v39  ;;  %v2052_v53 = vpack.c.bf16 %v816_v52, %v812_v51  ;;  %v876_v37 = vld [vmem:[#allocation18 + $0x288] sm:$0xff]  ;;  %v891_v52 = vld [vmem:[#allocation18 + $0x300] sm:$0xff] }
 0x3c1   :  { %v2084_v39 = vpack.c.bf16 %v880_v38, %v876_v37  ;;  %v846_v37 = vld [vmem:[#allocation18 + $0x198] sm:$0xff] }
 0x3c2   :  { %2019 = vmatpush1.bf16.msra.mxu1 %v2018_v57  ;;  %v820_v57 = vld [vmem:[#allocation18 + $0xc8] sm:$0xff]  ;;  %v850_v38 = vld [vmem:[#allocation18 + $0x1b8] sm:$0xff] }
 0x3c3   :  { %2021 = vmatprep.subr.bf16.mxu1 %v2020_v58  ;;  %v824_v58 = vld [vmem:[#allocation18 + $0xe8] sm:$0xff]  ;;  %v2132_v40 = vpack.c.bf16 %v850_v38, %v846_v37  ;;  %v918_v38 = vld [vmem:[#allocation18 + $0x3d8] sm:$0xff] }
 0x3c4   :  { %v2056_v59 = vpack.c.bf16 %v824_v58, %v820_v57  ;;  %v899_v58 = vld [vmem:[#allocation18 + $0x340] sm:$0xff]  ;;  %v920_v37 = vld [vmem:[#allocation18 + $0x3e8] sm:$0xff] }
 0x3c6   :  { %2023 = vmatpush1.bf16.msra.mxu1 %v2022_v63  ;;  %v828_v63 = vld [vmem:[#allocation18 + $0x108] sm:$0xff] }
 0x3c7   :  { %2025 = vmatprep.subr.bf16.mxu1 %v2024_v1  ;;  %v832_v1 = vld [vmem:[#allocation18 + $0x128] sm:$0xff] }
 0x3c8   :  { %v2060_v2 = vpack.c.bf16 %v832_v1, %v828_v63 }
 0x3ca   :  { %2027 = vmatpush1.bf16.msra.mxu1 %v2026_v6  ;;  %v836_v6 = vld [vmem:[#allocation18 + $0x148] sm:$0xff] }
 0x3cb   :  { %2029 = vmatprep.subr.bf16.mxu1 %v2028_v7  ;;  %v840_v7 = vld [vmem:[#allocation18 + $0x168] sm:$0xff] }
 0x3cc   :  { %v2064_v8 = vpack.c.bf16 %v840_v7, %v836_v6 }
 0x3ce   :  { %2031 = vmatpush1.bf16.msra.mxu1 %v2030_v12  ;;  %v844_v12 = vld [vmem:[#allocation18 + $0x188] sm:$0xff] }
 0x3cf   :  { %2033 = vmatprep.subr.bf16.mxu1 %v2032_v14  ;;  %v848_v14 = vld [vmem:[#allocation18 + $0x1a8] sm:$0xff] }
 0x3d0   :  { %v2068_v15 = vpack.c.bf16 %v848_v14, %v844_v12  ;;  %v814_v12 = vld [vmem:[#allocation18 + $0x98] sm:$0xff] }
 0x3d1   :  { %v818_v14 = vld [vmem:[#allocation18 + $0xb8] sm:$0xff] }
 0x3d2   :  { %2035 = vmatpush1.bf16.msra.mxu1 %v2034_v19  ;;  %v852_v19 = vld [vmem:[#allocation18 + $0x1c8] sm:$0xff]  ;;  %v2116_v16 = vpack.c.bf16 %v818_v14, %v814_v12 }
 0x3d3   :  { %2037 = vmatprep.subr.bf16.mxu1 %v2036_v20  ;;  %v856_v20 = vld [vmem:[#allocation18 + $0x1e8] sm:$0xff] }
 0x3d6   :  { %2039 = vmatpush1.bf16.msra.mxu1 %v2038_v29  ;;  %v863_v29 = vld [vmem:[#allocation18 + $0x220] sm:$0xff] }
 0x3d7   :  { %2041 = vmatprep.subr.bf16.mxu1 %v2040_v32  ;;  %v2078_v30 = vpack.c.bf16 %v863_v29, %v859_v28  ;;  %v872_v32 = vld [vmem:[#allocation18 + $0x268] sm:$0xff]  ;;  %v829_v29 = vld [vmem:[#allocation18 + $0x110] sm:$0xff] }
 0x3d8   :  { %v2080_v33 = vpack.c.bf16 %v872_v32, %v868_v31  ;;  %v838_v31 = vld [vmem:[#allocation18 + $0x158] sm:$0xff] }
 0x3d9   :  { %v842_v32 = vld [vmem:[#allocation18 + $0x178] sm:$0xff] }
 0x3da   :  { %2043 = vmatpush1.bf16.msra.mxu1 %v2042_v35  ;;  %v871_v35 = vld [vmem:[#allocation18 + $0x260] sm:$0xff] }
 0x3db   :  { %2109 = vmatprep.subr.bf16.mxu1 %v2108_v43  ;;  %v2082_v36 = vpack.c.bf16 %v871_v35, %v867_v34  ;;  %v884_v43 = vld [vmem:[#allocation18 + $0x2c8] sm:$0xff]  ;;  %v2128_v34 = vpack.c.bf16 %v842_v32, %v838_v31  ;;  %v837_v35 = vld [vmem:[#allocation18 + $0x150] sm:$0xff] }
 0x490   :  { %v579_v22 = vpop.f32.mrb[6].mxu1 }
 0x491   :  { %v580_v23 = vadd.f32 %v1782_v21, %v579_v22  ;;  %v1906_v24 = vpop.f32.mrb[7].mxu1  ;;  %v2072_v21 = vpack.c.bf16 %v856_v20, %v852_v19  ;;  %v851_v22 = vld [vmem:[#allocation18 + $0x1c0] sm:$0xff]  ;;  %v822_v19 = vld [vmem:[#allocation18 + $0xd8] sm:$0xff] }
 0x492   :  { %v826_v20 = vld [vmem:[#allocation18 + $0xf8] sm:$0xff] }
 0x493   :  { %v583_v25 = vmul.f32 0.01, %v580_v23 }
 0x495   :  { %v584_v26 = vmax.f32 %v580_v23, %v583_v25  ;;  %v855_v23 = vld [vmem:[#allocation18 + $0x1e0] sm:$0xff]  ;;  %v860_v25 = vld [vmem:[#allocation18 + $0x208] sm:$0xff] }
 0x496   :  { %v2074_v24 = vpack.c.bf16 %v855_v23, %v851_v22  ;;  %v2120_v22 = vpack.c.bf16 %v826_v20, %v822_v19  ;;  %v821_v23 = vld [vmem:[#allocation18 + $0xd0] sm:$0xff] }
 0x497   :  { %1924 = vmatmul.mubr.msk.f32.vlgmr.msra.gmra.mrb[0].mxu0 %vm600_vm6, %v584_v26  ;;  %v864_v26 = vld [vmem:[#allocation18 + $0x228] sm:$0xff] }
 0x498   :  { %2047 = vmatpush1.bf16.msra.mxu0 %v2046_v44  ;;  %v2076_v27 = vpack.c.bf16 %v864_v26, %v860_v25  ;;  %v888_v44 = vld [vmem:[#allocation18 + $0x2e8] sm:$0xff]  ;;  %v830_v25 = vld [vmem:[#allocation18 + $0x118] sm:$0xff] }
 0x499   :  { %2049 = vmatprep.subr.bf16.mxu0 %v2048_v47  ;;  %v2088_v45 = vpack.c.bf16 %v888_v44, %v884_v43  ;;  %v887_v47 = vld [vmem:[#allocation18 + $0x2e0] sm:$0xff]  ;;  %v834_v26 = vld [vmem:[#allocation18 + $0x138] sm:$0xff] }
 0x49a   :  { %v2090_v48 = vpack.c.bf16 %v887_v47, %v883_v46  ;;  %v2124_v28 = vpack.c.bf16 %v834_v26, %v830_v25  ;;  %v854_v43 = vld [vmem:[#allocation18 + $0x1d8] sm:$0xff]  ;;  %v853_v47 = vld [vmem:[#allocation18 + $0x1d0] sm:$0xff]  ;;  %v912_v25 = vld [vmem:[#allocation18 + $0x3a8] sm:$0xff] }
 0x49b   :  { %v858_v44 = vld [vmem:[#allocation18 + $0x1f8] sm:$0xff] }
 0x49c   :  { %2051 = vmatpush1.bf16.msra.mxu0 %v2050_v50  ;;  %v896_v50 = vld [vmem:[#allocation18 + $0x328] sm:$0xff]  ;;  %v2136_v46 = vpack.c.bf16 %v858_v44, %v854_v43  ;;  %v910_v26 = vld [vmem:[#allocation18 + $0x398] sm:$0xff] }
 0x49d   :  { %2053 = vmatprep.subr.bf16.mxu0 %v2052_v53  ;;  %v2092_v51 = vpack.c.bf16 %v896_v50, %v892_v49  ;;  %v895_v53 = vld [vmem:[#allocation18 + $0x320] sm:$0xff]  ;;  %v862_v49 = vld [vmem:[#allocation18 + $0x218] sm:$0xff] }
 0x49e   :  { %v2094_v54 = vpack.c.bf16 %v895_v53, %v891_v52  ;;  %v866_v50 = vld [vmem:[#allocation18 + $0x238] sm:$0xff]  ;;  %v861_v53 = vld [vmem:[#allocation18 + $0x210] sm:$0xff] }
 0x49f   :  { %v2140_v52 = vpack.c.bf16 %v866_v50, %v862_v49  ;;  %v1098_v49 = vld [vmem:[#allocation19 + $0x18] sm:$0xff] }
 0x4a0   :  { %2055 = vmatpush1.bf16.msra.mxu0 %v2054_v56  ;;  %v904_v56 = vld [vmem:[#allocation18 + $0x368] sm:$0xff] }
 0x4a1   :  { %2057 = vmatprep.subr.bf16.mxu0 %v2056_v59  ;;  %v2096_v57 = vpack.c.bf16 %v904_v56, %v900_v55  ;;  %v903_v59 = vld [vmem:[#allocation18 + $0x360] sm:$0xff]  ;;  %v870_v55 = vld [vmem:[#allocation18 + $0x258] sm:$0xff] }
 0x4a2   :  { %v2098_v60 = vpack.c.bf16 %v903_v59, %v899_v58  ;;  %v874_v56 = vld [vmem:[#allocation18 + $0x278] sm:$0xff]  ;;  %v869_v59 = vld [vmem:[#allocation18 + $0x250] sm:$0xff] }
 0x4a3   :  { %v2144_v58 = vpack.c.bf16 %v874_v56, %v870_v55 }
 0x4a4   :  { %2059 = vmatpush1.bf16.msra.mxu0 %v2058_v62 }
 0x4a5   :  { %2061 = vmatprep.subr.bf16.mxu0 %v2060_v2  ;;  %v797_v2 = vld [vmem:[#allocation18 + $0x10] sm:$0xff] }
 0x4a6   :  { %v2110_v7 = vpack.c.bf16 %v801_v3, %v797_v2  ;;  %v877_v2 = vld [vmem:[#allocation18 + $0x290] sm:$0xff] }
 0x4a7   :  { %v881_v3 = vld [vmem:[#allocation18 + $0x2b0] sm:$0xff] }
 0x4a8   :  { %2063 = vmatpush1.bf16.msra.mxu0 %v2062_v5  ;;  %v810_v5 = vld [vmem:[#allocation18 + $0x78] sm:$0xff] }
 0x4a9   :  { %2065 = vmatprep.subr.bf16.mxu0 %v2064_v8  ;;  %v2112_v9 = vpack.c.bf16 %v810_v5, %v806_v4  ;;  %v886_v4 = vld [vmem:[#allocation18 + $0x2d8] sm:$0xff] }
 0x4aa   :  { %v890_v5 = vld [vmem:[#allocation18 + $0x2f8] sm:$0xff] }
 0x4ac   :  { %2067 = vmatpush1.bf16.msra.mxu0 %v2066_v11  ;;  %v809_v11 = vld [vmem:[#allocation18 + $0x70] sm:$0xff] }
 0x4ad   :  { %2069 = vmatprep.subr.bf16.mxu0 %v2068_v15  ;;  %v2114_v15 = vpack.c.bf16 %v809_v11, %v805_v10  ;;  %v894_v10 = vld [vmem:[#allocation18 + $0x318] sm:$0xff] }
 0x4ae   :  { %v898_v11 = vld [vmem:[#allocation18 + $0x338] sm:$0xff] }
 0x4af   :  { %v2156_v14 = vpack.c.bf16 %v898_v11, %v894_v10  ;;  %v1101_v10 = vld [vmem:[#allocation19 + $0x30] sm:$0xff]  ;;  %v1104_v11 = vld [vmem:[#allocation19 + $0x48] sm:$0xff] }
 0x4b0   :  { %2071 = vmatpush1.bf16.msra.mxu0 %v2070_v18  ;;  %v817_v18 = vld [vmem:[#allocation18 + $0xb0] sm:$0xff] }
 0x4b1   :  { %2073 = vmatprep.subr.bf16.mxu0 %v2072_v21  ;;  %v2118_v21 = vpack.c.bf16 %v817_v18, %v813_v17  ;;  %v902_v17 = vld [vmem:[#allocation18 + $0x358] sm:$0xff] }
 0x4b2   :  { %v906_v18 = vld [vmem:[#allocation18 + $0x378] sm:$0xff] }
 0x4b3   :  { %v2160_v20 = vpack.c.bf16 %v906_v18, %v902_v17  ;;  %v1105_v17 = vld [vmem:[#allocation19 + $0x50] sm:$0xff]  ;;  %v1108_v18 = vld [vmem:[#allocation19 + $0x68] sm:$0xff] }
 0x4b4   :  { %2075 = vmatpush1.bf16.msra.mxu0 %v2074_v24  ;;  %v825_v24 = vld [vmem:[#allocation18 + $0xf0] sm:$0xff] }
 0x4b5   :  { %2077 = vmatprep.subr.bf16.mxu0 %v2076_v27  ;;  %v2122_v27 = vpack.c.bf16 %v825_v24, %v821_v23  ;;  %v908_v24 = vld [vmem:[#allocation18 + $0x388] sm:$0xff] }
 0x4b8   :  { %2079 = vmatpush1.bf16.msra.mxu0 %v2078_v30  ;;  %v833_v30 = vld [vmem:[#allocation18 + $0x130] sm:$0xff] }
 0x4b9   :  { %2081 = vmatprep.subr.bf16.mxu0 %v2080_v33  ;;  %v2126_v33 = vpack.c.bf16 %v833_v30, %v829_v29  ;;  %v907_v29 = vld [vmem:[#allocation18 + $0x380] sm:$0xff] }
 0x4ba   :  { %v911_v30 = vld [vmem:[#allocation18 + $0x3a0] sm:$0xff] }
 0x4bb   :  { %v2102_v32 = vpack.c.bf16 %v911_v30, %v907_v29  ;;  %v1113_v29 = vld [vmem:[#allocation19 + $0x90] sm:$0xff]  ;;  %v1116_v30 = vld [vmem:[#allocation19 + $0xa8] sm:$0xff] }
 0x4bc   :  { %2083 = vmatpush1.bf16.msra.mxu0 %v2082_v36  ;;  %v841_v36 = vld [vmem:[#allocation18 + $0x170] sm:$0xff] }
 0x4bd   :  { %2085 = vmatprep.subr.bf16.mxu0 %v2084_v39  ;;  %v2130_v39 = vpack.c.bf16 %v841_v36, %v837_v35  ;;  %v916_v36 = vld [vmem:[#allocation18 + $0x3c8] sm:$0xff] }
 0x4c0   :  { %2087 = vmatpush1.bf16.msra.mxu0 %v2086_v42  ;;  %v849_v42 = vld [vmem:[#allocation18 + $0x1b0] sm:$0xff] }
 0x4c1   :  { %2089 = vmatprep.subr.bf16.mxu0 %v2088_v45  ;;  %v2134_v45 = vpack.c.bf16 %v849_v42, %v845_v41  ;;  %v915_v41 = vld [vmem:[#allocation18 + $0x3c0] sm:$0xff] }
 0x4c2   :  { %v919_v42 = vld [vmem:[#allocation18 + $0x3e0] sm:$0xff] }
 0x4c3   :  { %v2106_v44 = vpack.c.bf16 %v919_v42, %v915_v41  ;;  %v1121_v41 = vld [vmem:[#allocation19 + $0xd0] sm:$0xff]  ;;  %v1124_v42 = vld [vmem:[#allocation19 + $0xe8] sm:$0xff] }
 0x4c4   :  { %2091 = vmatpush1.bf16.msra.mxu0 %v2090_v48  ;;  %v857_v48 = vld [vmem:[#allocation18 + $0x1f0] sm:$0xff] }
 0x4c5   :  { %2093 = vmatprep.subr.bf16.mxu0 %v2092_v51  ;;  %v2138_v51 = vpack.c.bf16 %v857_v48, %v853_v47  ;;  %v1096_v48 = vld [vmem:[#allocation19 + $0x8] sm:$0xff] }
 0x4c6   :  { %v2172_v50 = vpack.c.bf16 %v1098_v49, %v1096_v48  ;;  %v1128_v48 = vld [vmem:[#allocation19 + $0x108] sm:$0xff]  ;;  %v1130_v49 = vld [vmem:[#allocation19 + $0x118] sm:$0xff] }
 0x4c8   :  { %2095 = vmatpush1.bf16.msra.mxu0 %v2094_v54  ;;  %v865_v54 = vld [vmem:[#allocation18 + $0x230] sm:$0xff] }
 0x4c9   :  { %2097 = vmatprep.subr.bf16.mxu0 %v2096_v57  ;;  %v2142_v57 = vpack.c.bf16 %v865_v54, %v861_v53  ;;  %v708_v54 = vld [vmem:[#allocation16] sm:$0x3] }
 0x4cc   :  { %2099 = vmatpush1.bf16.msra.mxu0 %v2098_v60  ;;  %v873_v60 = vld [vmem:[#allocation18 + $0x270] sm:$0xff] }
 0x56a   :  { %v670_v62 = vpop.f32.mrb[0].mxu0 }
 0x56b   :  { %v671_v63 = vadd.f32 %v1784_v61, %v670_v62  ;;  %v1925_v1 = vpop.f32.mrb[1].mxu0  ;;  %v878_v61 = vld [vmem:[#allocation18 + $0x298] sm:$0xff] }
 0x56c   :  { %v882_v62 = vld [vmem:[#allocation18 + $0x2b8] sm:$0xff] }
 0x56d   :  { %v674_v6 = vmul.f32 0.01, %v671_v63  ;;  %v2148_v1 = vpack.c.bf16 %v882_v62, %v878_v61 }
 0x56f   :  { %v675_v8 = vmax.f32 %v671_v63, %v674_v6  ;;  %v2146_v63 = vpack.c.bf16 %v873_v60, %v869_v59  ;;  %v2150_v6 = vpack.c.bf16 %v881_v3, %v877_v2  ;;  %v1100_v3 = vld [vmem:[#allocation19 + $0x28] sm:$0xff] }
 0x571   :  { %785 = vmatmul.mubr.f32.vlgmr.msra.gmra.mrb[8].mxu1 %v675_v8  ;;  %v885_v8 = vld [vmem:[#allocation18 + $0x2d0] sm:$0xff] }
 0x572   :  { %2111 = vmatpush1.bf16.msra.mxu1 %v2110_v7  ;;  %v2152_v7 = vpack.c.bf16 %v890_v5, %v886_v4  ;;  %v1102_v4 = vld [vmem:[#allocation19 + $0x38] sm:$0xff] }
 0x573   :  { %2113 = vmatprep.subr.bf16.mxu1 %v2112_v9  ;;  %v889_v9 = vld [vmem:[#allocation18 + $0x2f0] sm:$0xff] }
 0x574   :  { %v2154_v12 = vpack.c.bf16 %v889_v9, %v885_v8  ;;  %v2176_v8 = vpack.c.bf16 %v1102_v4, %v1100_v3  ;;  %v1099_v9 = vld [vmem:[#allocation19 + $0x20] sm:$0xff] }
 0x575   :  { %v1135_v4 = vld [vmem:[#allocation19 + $0x140] sm:$0xff] }
 0x576   :  { %2115 = vmatpush1.bf16.msra.mxu1 %v2114_v15  ;;  %v893_v15 = vld [vmem:[#allocation18 + $0x310] sm:$0xff] }
 0x577   :  { %2117 = vmatprep.subr.bf16.mxu1 %v2116_v16  ;;  %v897_v16 = vld [vmem:[#allocation18 + $0x330] sm:$0xff] }
 0x578   :  { %v2158_v19 = vpack.c.bf16 %v897_v16, %v893_v15  ;;  %v1103_v16 = vld [vmem:[#allocation19 + $0x40] sm:$0xff] }
 0x57a   :  { %2119 = vmatpush1.bf16.msra.mxu1 %v2118_v21  ;;  %v901_v21 = vld [vmem:[#allocation18 + $0x350] sm:$0xff] }
 0x57b   :  { %2121 = vmatprep.subr.bf16.mxu1 %v2120_v22  ;;  %v905_v22 = vld [vmem:[#allocation18 + $0x370] sm:$0xff] }
 0x57c   :  { %v2162_v23 = vpack.c.bf16 %v905_v22, %v901_v21  ;;  %v1107_v22 = vld [vmem:[#allocation19 + $0x60] sm:$0xff] }
 0x57e   :  { %2123 = vmatpush1.bf16.msra.mxu1 %v2122_v27  ;;  %v2100_v27 = vpack.c.bf16 %v912_v25, %v908_v24  ;;  %v1112_v24 = vld [vmem:[#allocation19 + $0x88] sm:$0xff]  ;;  %v1114_v25 = vld [vmem:[#allocation19 + $0x98] sm:$0xff] }
 0x57f   :  { %2125 = vmatprep.subr.bf16.mxu1 %v2124_v28  ;;  %v914_v28 = vld [vmem:[#allocation18 + $0x3b8] sm:$0xff] }
 0x580   :  { %v2164_v31 = vpack.c.bf16 %v914_v28, %v910_v26  ;;  %2101 = vmatprep.subr.bf16.mxu0 %v2100_v27  ;;  %v2188_v27 = vpack.c.bf16 %v1114_v25, %v1112_v24  ;;  %v1111_v28 = vld [vmem:[#allocation19 + $0x80] sm:$0xff]  ;;  %v1149_v24 = vld [vmem:[#allocation19 + $0x1b0] sm:$0xff] }
 0x581   :  { %2103 = vmatpush1.bf16.msra.mxu0 %v2102_v32  ;;  %v2190_v32 = vpack.c.bf16 %v1113_v29, %v1111_v28  ;;  %v1151_v29 = vld [vmem:[#allocation19 + $0x1c0] sm:$0xff] }
 0x582   :  { %2127 = vmatpush1.bf16.msra.mxu1 %v2126_v33  ;;  %v909_v33 = vld [vmem:[#allocation18 + $0x390] sm:$0xff] }
 0x583   :  { %2129 = vmatprep.subr.bf16.mxu1 %v2128_v34  ;;  %v913_v34 = vld [vmem:[#allocation18 + $0x3b0] sm:$0xff] }
 0x584   :  { %v2166_v35 = vpack.c.bf16 %v913_v34, %v909_v33  ;;  %v1115_v34 = vld [vmem:[#allocation19 + $0xa0] sm:$0xff] }
 0x586   :  { %2131 = vmatpush1.bf16.msra.mxu1 %v2130_v39  ;;  %v2104_v39 = vpack.c.bf16 %v920_v37, %v916_v36  ;;  %v1120_v36 = vld [vmem:[#allocation19 + $0xc8] sm:$0xff]  ;;  %v1122_v37 = vld [vmem:[#allocation19 + $0xd8] sm:$0xff] }
 0x587   :  { %2133 = vmatprep.subr.bf16.mxu1 %v2132_v40  ;;  %v922_v40 = vld [vmem:[#allocation18 + $0x3f8] sm:$0xff] }
 0x588   :  { %v2168_v43 = vpack.c.bf16 %v922_v40, %v918_v38  ;;  %2105 = vmatprep.subr.bf16.mxu0 %v2104_v39  ;;  %v2196_v39 = vpack.c.bf16 %v1122_v37, %v1120_v36  ;;  %v1119_v40 = vld [vmem:[#allocation19 + $0xc0] sm:$0xff]  ;;  %v1157_v36 = vld [vmem:[#allocation19 + $0x1f0] sm:$0xff] }
 0x589   :  { %2107 = vmatpush1.bf16.msra.mxu0 %v2106_v44  ;;  %v2198_v44 = vpack.c.bf16 %v1121_v41, %v1119_v40  ;;  %v1397_v41 = vld [vmem:[#allocation21 + $0x80] sm:$0xff] }
 0x58a   :  { %2135 = vmatpush1.bf16.msra.mxu1 %v2134_v45  ;;  %v917_v45 = vld [vmem:[#allocation18 + $0x3d0] sm:$0xff]  ;;  %2173 = vmatprep.subr.bf16.mxu0 %v2172_v50 }
 0x58b   :  { %2137 = vmatprep.subr.bf16.mxu1 %v2136_v46  ;;  %v921_v46 = vld [vmem:[#allocation18 + $0x3f0] sm:$0xff] }
 0x58c   :  { %v2170_v47 = vpack.c.bf16 %v921_v46, %v917_v45  ;;  %v1123_v46 = vld [vmem:[#allocation19 + $0xe0] sm:$0xff] }
 0x58e   :  { %2139 = vmatpush1.bf16.msra.mxu1 %v2138_v51  ;;  %v710_v51 = vlaneseq }
 0x58f   :  { %2141 = vmatprep.subr.bf16.mxu1 %v2140_v52 }
 0x590   :  { %v3158_v52 = vshrl.u32 %v710_v51, 7  ;;  %v2204_v51 = vpack.c.bf16 %v1130_v49, %v1128_v48 }
 0x592   :  { %2143 = vmatpush1.bf16.msra.mxu1 %v2142_v57  ;;  %v3161_v53 = vsub.s32 0, %v3158_v52  ;;  %v3164_v55 = vsub.s32 1, %v3158_v52 }
 0x593   :  { %2145 = vmatprep.subr.bf16.mxu1 %v2144_v58 }
 0x594   :  { %v713_v56 = vrot.slane %v708_v54, %v3161_v53  ;;  %v717_v57 = vrot.slane %v708_v54, %v3164_v55  ;;  %v1127_v54 = vld [vmem:[#allocation19 + $0x100] sm:$0xff] }
 0x596   :  { %2147 = vmatpush1.bf16.msra.mxu1 %v2146_v63  ;;  %v1095_v63 = vld [vmem:[#allocation19] sm:$0xff] }
 0x597   :  { %2149 = vmatprep.subr.bf16.mxu1 %v2148_v1  ;;  %v1097_v1 = vld [vmem:[#allocation19 + $0x10] sm:$0xff] }
 0x59a   :  { %2151 = vmatpush1.bf16.msra.mxu1 %v2150_v6  ;;  %v2174_v6 = vpack.c.bf16 %v1097_v1, %v1095_v63  ;;  %v1136_v63 = vld [vmem:[#allocation19 + $0x148] sm:$0xff]  ;;  %v1138_v1 = vld [vmem:[#allocation19 + $0x158] sm:$0xff] }
 0x59b   :  { %2153 = vmatprep.subr.bf16.mxu1 %v2152_v7  ;;  %v2212_v3 = vpack.c.bf16 %v1138_v1, %v1136_v63 }
 0x59e   :  { %2155 = vmatpush1.bf16.msra.mxu1 %v2154_v12  ;;  %v1106_v12 = vld [vmem:[#allocation19 + $0x58] sm:$0xff] }
 0x59f   :  { %2157 = vmatprep.subr.bf16.mxu1 %v2156_v14  ;;  %v2178_v14 = vpack.c.bf16 %v1101_v10, %v1099_v9  ;;  %v2180_v15 = vpack.c.bf16 %v1106_v12, %v1104_v11  ;;  %v1139_v10 = vld [vmem:[#allocation19 + $0x160] sm:$0xff]  ;;  %v1141_v11 = vld [vmem:[#allocation19 + $0x170] sm:$0xff]  ;;  %v1144_v12 = vld [vmem:[#allocation19 + $0x188] sm:$0xff] }
 0x5a2   :  { %2159 = vmatpush1.bf16.msra.mxu1 %v2158_v19  ;;  %v1110_v19 = vld [vmem:[#allocation19 + $0x78] sm:$0xff] }
 0x5a3   :  { %2161 = vmatprep.subr.bf16.mxu1 %v2160_v20  ;;  %v2182_v20 = vpack.c.bf16 %v1105_v17, %v1103_v16  ;;  %v2184_v21 = vpack.c.bf16 %v1110_v19, %v1108_v18  ;;  %v1143_v17 = vld [vmem:[#allocation19 + $0x180] sm:$0xff]  ;;  %v1145_v18 = vld [vmem:[#allocation19 + $0x190] sm:$0xff]  ;;  %v1148_v19 = vld [vmem:[#allocation19 + $0x1a8] sm:$0xff] }
 0x5a6   :  { %2163 = vmatpush1.bf16.msra.mxu1 %v2162_v23  ;;  %v1109_v23 = vld [vmem:[#allocation19 + $0x70] sm:$0xff] }
 0x5a7   :  { %2165 = vmatprep.subr.bf16.mxu1 %v2164_v31  ;;  %v2186_v26 = vpack.c.bf16 %v1109_v23, %v1107_v22  ;;  %v1118_v31 = vld [vmem:[#allocation19 + $0xb8] sm:$0xff]  ;;  %v1147_v23 = vld [vmem:[#allocation19 + $0x1a0] sm:$0xff] }
 0x5a8   :  { %v2192_v33 = vpack.c.bf16 %v1118_v31, %v1116_v30  ;;  %v2226_v25 = vpack.c.bf16 %v1149_v24, %v1147_v23  ;;  %v1153_v30 = vld [vmem:[#allocation19 + $0x1d0] sm:$0xff] }
 0x5a9   :  { %v2230_v31 = vpack.c.bf16 %v1153_v30, %v1151_v29 }
 0x5aa   :  { %2167 = vmatpush1.bf16.msra.mxu1 %v2166_v35  ;;  %v1117_v35 = vld [vmem:[#allocation19 + $0xb0] sm:$0xff] }
 0x5ab   :  { %2169 = vmatprep.subr.bf16.mxu1 %v2168_v43  ;;  %v2194_v38 = vpack.c.bf16 %v1117_v35, %v1115_v34  ;;  %v1126_v43 = vld [vmem:[#allocation19 + $0xf8] sm:$0xff]  ;;  %v1155_v35 = vld [vmem:[#allocation19 + $0x1e0] sm:$0xff] }
 0x5ac   :  { %v2200_v45 = vpack.c.bf16 %v1126_v43, %v1124_v42  ;;  %v2234_v37 = vpack.c.bf16 %v1157_v36, %v1155_v35  ;;  %v1398_v42 = vld [vmem:[#allocation21 + $0x88] sm:$0xff]  ;;  %v1381_v43 = vld [vmem:[#allocation21] sm:$0xff]  ;;  %v1166_v36 = vld [vmem:[#allocation19 + $0x238] sm:$0xff] }
 0x5ad   :  { %v1164_v35 = vld [vmem:[#allocation19 + $0x228] sm:$0xff] }
 0x5ae   :  { %2171 = vmatpush1.bf16.msra.mxu1 %v2170_v47  ;;  %v1125_v47 = vld [vmem:[#allocation19 + $0xf0] sm:$0xff] }
 0x5af   :  { %v2202_v50 = vpack.c.bf16 %v1125_v47, %v1123_v46  ;;  %v1399_v46 = vld [vmem:[#allocation21 + $0x90] sm:$0xff]  ;;  %v1400_v47 = vld [vmem:[#allocation21 + $0x98] sm:$0xff] }
 0x5b0   :  { %v2304_v49 = vpack.c.bf16 %v1400_v47, %v1399_v46 }
 0x644   :  { %v786_v58 = vpop.f32.mrb[8].mxu1 }
 0x645   :  { %v787_v59 = vadd.f32 %v786_v58, %v713_v56  ;;  %v788_v60 = vpop.f32.mrb[9].mxu1  ;;  %v1129_v56 = vld [vmem:[#allocation19 + $0x110] sm:$0xff]  ;;  %v1134_v58 = vld [vmem:[#allocation19 + $0x138] sm:$0xff] }
 0x646   :  { %v789_v61 = vadd.f32 %v788_v60, %v717_v57  ;;  %v1132_v57 = vld [vmem:[#allocation19 + $0x128] sm:$0xff] }
 0x647   :  { %v791_v62 = vmul.f32 0.01, %v787_v59  ;;  %v2208_v60 = vpack.c.bf16 %v1134_v58, %v1132_v57 }
 0x648   :  { %v792_v2 = vmul.f32 0.01, %v789_v61 }
 0x649   :  { %v793_v7 = vmax.f32 %v787_v59, %v791_v62  ;;  %v2206_v59 = vpack.c.bf16 %v1129_v56, %v1127_v54  ;;  %v1133_v62 = vld [vmem:[#allocation19 + $0x130] sm:$0xff]  ;;  %v1401_v54 = vld [vmem:[#allocation21 + $0xa0] sm:$0xff]  ;;  %v1402_v56 = vld [vmem:[#allocation21 + $0xa8] sm:$0xff] }
 0x64a   :  { %v794_v5 = vmax.f32 %v789_v61, %v792_v2  ;;  %v1131_v61 = vld [vmem:[#allocation19 + $0x120] sm:$0xff]  ;;  %v2308_v58 = vpack.c.bf16 %v1402_v56, %v1401_v54 }
 0x64b   :  { %v2210_v2 = vpack.c.bf16 %v1133_v62, %v1131_v61  ;;  %v1403_v61 = vld [vmem:[#allocation21 + $0xb0] sm:$0xff]  ;;  %v1404_v62 = vld [vmem:[#allocation21 + $0xb8] sm:$0xff] }
 0x64c   :  { %1009 = vmatprep.mubr.f32.mxu0 %v794_v5  ;;  %1080 = vmatprep.mubr.f32.mxu1 %v794_v5  ;;  %v1137_v5 = vld [vmem:[#allocation19 + $0x150] sm:$0xff]  ;;  %v2312_v1 = vpack.c.bf16 %v1404_v62, %v1403_v61 }
 0x64d   :  { %1010 = vmatmul.mubr.f32.vlgmr.msra.gmra.mrb[2].mxu0 %v793_v7  ;;  %1081 = vmatmul.mubr.f32.vlgmr.msra.gmra.mrb[10].mxu1 %v793_v7  ;;  %v1142_v7 = vld [vmem:[#allocation19 + $0x178] sm:$0xff] }
 0x64e   :  { %2175 = vmatpush1.bf16.msra.mxu0 %v2174_v6  ;;  %v1140_v6 = vld [vmem:[#allocation19 + $0x168] sm:$0xff] }
 0x64f   :  { %2177 = vmatprep.subr.bf16.mxu0 %v2176_v8  ;;  %v2214_v8 = vpack.c.bf16 %v1137_v5, %v1135_v4  ;;  %v2216_v9 = vpack.c.bf16 %v1142_v7, %v1140_v6  ;;  %v1405_v4 = vld [vmem:[#allocation21 + $0xc0] sm:$0xff]  ;;  %v1406_v5 = vld [vmem:[#allocation21 + $0xc8] sm:$0xff] }
 0x650   :  { %v2316_v7 = vpack.c.bf16 %v1406_v5, %v1405_v4 }
 0x652   :  { %2179 = vmatpush1.bf16.msra.mxu0 %v2178_v14  ;;  %v1146_v14 = vld [vmem:[#allocation19 + $0x198] sm:$0xff] }
 0x653   :  { %2181 = vmatprep.subr.bf16.mxu0 %v2180_v15  ;;  %v2218_v15 = vpack.c.bf16 %v1141_v11, %v1139_v10  ;;  %v2220_v16 = vpack.c.bf16 %v1146_v14, %v1144_v12  ;;  %v1407_v10 = vld [vmem:[#allocation21 + $0xd0] sm:$0xff]  ;;  %v1408_v11 = vld [vmem:[#allocation21 + $0xd8] sm:$0xff] }
 0x654   :  { %v2320_v14 = vpack.c.bf16 %v1408_v11, %v1407_v10 }
 0x656   :  { %2183 = vmatpush1.bf16.msra.mxu0 %v2182_v20  ;;  %v1150_v20 = vld [vmem:[#allocation19 + $0x1b8] sm:$0xff] }
 0x657   :  { %2185 = vmatprep.subr.bf16.mxu0 %v2184_v21  ;;  %v2222_v21 = vpack.c.bf16 %v1145_v18, %v1143_v17  ;;  %v2224_v22 = vpack.c.bf16 %v1150_v20, %v1148_v19  ;;  %v3171_v18 = vld [vmem:[%s3325_s14] sm:$0xf]  ;;  %v939_v19 = vsub.s32 3, %v3158_v52 }
 0x658   :  { %v928_v20 = vrot.slane %v3171_v18, %v3161_v53 }
 0x65a   :  { %2187 = vmatpush1.bf16.msra.mxu0 %v2186_v26  ;;  %v1152_v26 = vld [vmem:[#allocation19 + $0x1c8] sm:$0xff] }
 0x65b   :  { %2189 = vmatprep.subr.bf16.mxu0 %v2188_v27  ;;  %v1154_v27 = vld [vmem:[#allocation19 + $0x1d8] sm:$0xff] }
 0x65c   :  { %v2228_v28 = vpack.c.bf16 %v1154_v27, %v1152_v26 }
 0x65e   :  { %2191 = vmatpush1.bf16.msra.mxu0 %v2190_v32  ;;  %v1156_v32 = vld [vmem:[#allocation19 + $0x1e8] sm:$0xff] }
 0x65f   :  { %2193 = vmatprep.subr.bf16.mxu0 %v2192_v33  ;;  %v1158_v33 = vld [vmem:[#allocation19 + $0x1f8] sm:$0xff] }
 0x660   :  { %v2232_v34 = vpack.c.bf16 %v1158_v33, %v1156_v32  ;;  %v1161_v32 = vld [vmem:[#allocation19 + $0x210] sm:$0xff] }
 0x662   :  { %2195 = vmatpush1.bf16.msra.mxu0 %v2194_v38  ;;  %v1160_v38 = vld [vmem:[#allocation19 + $0x208] sm:$0xff] }
 0x663   :  { %2197 = vmatprep.subr.bf16.mxu0 %v2196_v39  ;;  %v1162_v39 = vld [vmem:[#allocation19 + $0x218] sm:$0xff] }
 0x664   :  { %v2236_v40 = vpack.c.bf16 %v1162_v39, %v1160_v38 }
 0x666   :  { %2199 = vmatpush1.bf16.msra.mxu0 %v2198_v44  ;;  %v2300_v44 = vpack.c.bf16 %v1398_v42, %v1397_v41  ;;  %v1163_v41 = vld [vmem:[#allocation19 + $0x220] sm:$0xff]  ;;  %v1165_v42 = vld [vmem:[#allocation19 + $0x230] sm:$0xff] }
 0x667   :  { %2201 = vmatprep.subr.bf16.mxu0 %v2200_v45  ;;  %v1382_v45 = vld [vmem:[#allocation21 + $0x8] sm:$0xff]  ;;  %v2242_v46 = vpack.c.bf16 %v1165_v42, %v1163_v41  ;;  %v1206_v42 = vld [vmem:[#allocation19 + $0x378] sm:$0xff] }
 0x668   :  { %v2302_v48 = vpack.c.bf16 %v1382_v45, %v1381_v43  ;;  %2301 = vmatprep.subr.bf16.mxu1 %v2300_v44  ;;  %v1168_v44 = vld [vmem:[#allocation19 + $0x248] sm:$0xff]  ;;  %v1170_v45 = vld [vmem:[#allocation19 + $0x258] sm:$0xff] }
 0x669   :  { %v2244_v47 = vpack.c.bf16 %v1170_v45, %v1168_v44  ;;  %v1204_v41 = vld [vmem:[#allocation19 + $0x368] sm:$0xff]  ;;  %v1203_v45 = vld [vmem:[#allocation19 + $0x360] sm:$0xff] }
 0x66a   :  { %2203 = vmatpush1.bf16.msra.mxu0 %v2202_v50  ;;  %v1383_v50 = vld [vmem:[#allocation21 + $0x10] sm:$0xff]  ;;  %2303 = vmatpush3.bf16.msra.mxu1 %v2302_v48  ;;  %v1167_v48 = vld [vmem:[#allocation19 + $0x240] sm:$0xff]  ;;  %v2280_v44 = vpack.c.bf16 %v1206_v42, %v1204_v41 }
 0x66b   :  { %2205 = vmatprep.subr.bf16.mxu0 %v2204_v51  ;;  %v1384_v51 = vld [vmem:[#allocation21 + $0x18] sm:$0xff]  ;;  %2305 = vmatprep.subr.bf16.mxu1 %v2304_v49  ;;  %v1169_v49 = vld [vmem:[#allocation19 + $0x250] sm:$0xff] }
 0x66c   :  { %v2306_v57 = vpack.c.bf16 %v1384_v51, %v1383_v50  ;;  %v1172_v50 = vld [vmem:[#allocation19 + $0x268] sm:$0xff]  ;;  %v1174_v51 = vld [vmem:[#allocation19 + $0x278] sm:$0xff]  ;;  %v2246_v54 = vpack.c.bf16 %v1169_v49, %v1167_v48 }
 0x66d   :  { %v2248_v56 = vpack.c.bf16 %v1174_v51, %v1172_v50  ;;  %v1210_v48 = vld [vmem:[#allocation19 + $0x398] sm:$0xff]  ;;  %v1207_v51 = vld [vmem:[#allocation19 + $0x380] sm:$0xff] }
 0x66e   :  { %2207 = vmatpush1.bf16.msra.mxu0 %v2206_v59  ;;  %v1385_v59 = vld [vmem:[#allocation21 + $0x20] sm:$0xff]  ;;  %2307 = vmatpush3.bf16.msra.mxu1 %v2306_v57 }
 0x66f   :  { %2209 = vmatprep.subr.bf16.mxu0 %v2208_v60  ;;  %v1386_v60 = vld [vmem:[#allocation21 + $0x28] sm:$0xff]  ;;  %2309 = vmatprep.subr.bf16.mxu1 %v2308_v58  ;;  %v1171_v57 = vld [vmem:[#allocation19 + $0x260] sm:$0xff]  ;;  %v1173_v58 = vld [vmem:[#allocation19 + $0x270] sm:$0xff] }
 0x670   :  { %v2310_v63 = vpack.c.bf16 %v1386_v60, %v1385_v59  ;;  %v1176_v59 = vld [vmem:[#allocation19 + $0x288] sm:$0xff]  ;;  %v1178_v60 = vld [vmem:[#allocation19 + $0x298] sm:$0xff]  ;;  %v2250_v61 = vpack.c.bf16 %v1173_v58, %v1171_v57 }
 0x671   :  { %v2252_v62 = vpack.c.bf16 %v1178_v60, %v1176_v59  ;;  %v1214_v57 = vld [vmem:[#allocation19 + $0x3b8] sm:$0xff]  ;;  %v935_v59 = vsub.s32 2, %v3158_v52 }
 0x672   :  { %2211 = vmatpush1.bf16.msra.mxu0 %v2210_v2  ;;  %v1387_v2 = vld [vmem:[#allocation21 + $0x30] sm:$0xff]  ;;  %2311 = vmatpush3.bf16.msra.mxu1 %v2310_v63  ;;  %v1175_v63 = vld [vmem:[#allocation19 + $0x280] sm:$0xff] }
 0x673   :  { %2213 = vmatprep.subr.bf16.mxu0 %v2212_v3  ;;  %v1388_v3 = vld [vmem:[#allocation21 + $0x38] sm:$0xff]  ;;  %2313 = vmatprep.subr.bf16.mxu1 %v2312_v1  ;;  %v1177_v1 = vld [vmem:[#allocation19 + $0x290] sm:$0xff] }
 0x674   :  { %v2314_v6 = vpack.c.bf16 %v1388_v3, %v1387_v2  ;;  %v1180_v2 = vld [vmem:[#allocation19 + $0x2a8] sm:$0xff]  ;;  %v1182_v3 = vld [vmem:[#allocation19 + $0x2b8] sm:$0xff]  ;;  %v2254_v4 = vpack.c.bf16 %v1177_v1, %v1175_v63 }
 0x675   :  { %v2256_v5 = vpack.c.bf16 %v1182_v3, %v1180_v2  ;;  %v1216_v63 = vld [vmem:[#allocation19 + $0x3c8] sm:$0xff]  ;;  %v1218_v1 = vld [vmem:[#allocation19 + $0x3d8] sm:$0xff]  ;;  %v936_v3 = vrot.slane %v3171_v18, %v935_v59 }
 0x676   :  { %2215 = vmatpush1.bf16.msra.mxu0 %v2214_v8  ;;  %v1389_v8 = vld [vmem:[#allocation21 + $0x40] sm:$0xff]  ;;  %2315 = vmatpush3.bf16.msra.mxu1 %v2314_v6  ;;  %v1504_v59 = vld [vmem:[%s3330_s19 + $0x60] sm:$0xff] }
 0x677   :  { %2217 = vmatprep.subr.bf16.mxu0 %v2216_v9  ;;  %v1390_v9 = vld [vmem:[#allocation21 + $0x48] sm:$0xff]  ;;  %2317 = vmatprep.subr.bf16.mxu1 %v2316_v7  ;;  %v1179_v6 = vld [vmem:[#allocation19 + $0x2a0] sm:$0xff]  ;;  %v1181_v7 = vld [vmem:[#allocation19 + $0x2b0] sm:$0xff] }
 0x678   :  { %v2318_v12 = vpack.c.bf16 %v1390_v9, %v1389_v8  ;;  %v1184_v8 = vld [vmem:[#allocation19 + $0x2c8] sm:$0xff]  ;;  %v1186_v9 = vld [vmem:[#allocation19 + $0x2d8] sm:$0xff]  ;;  %v2258_v10 = vpack.c.bf16 %v1181_v7, %v1179_v6  ;;  %v1217_v6 = vld [vmem:[#allocation19 + $0x3d0] sm:$0xff] }
 0x679   :  { %v2260_v11 = vpack.c.bf16 %v1186_v9, %v1184_v8  ;;  %v1220_v7 = vld [vmem:[#allocation19 + $0x3e8] sm:$0xff]  ;;  %v1222_v8 = vld [vmem:[#allocation19 + $0x3f8] sm:$0xff] }
 0x67a   :  { %2219 = vmatpush1.bf16.msra.mxu0 %v2218_v15  ;;  %v1391_v15 = vld [vmem:[#allocation21 + $0x50] sm:$0xff]  ;;  %2319 = vmatpush3.bf16.msra.mxu1 %v2318_v12  ;;  %v1183_v12 = vld [vmem:[#allocation19 + $0x2c0] sm:$0xff] }
 0x67b   :  { %2221 = vmatprep.subr.bf16.mxu0 %v2220_v16  ;;  %v1392_v16 = vld [vmem:[#allocation21 + $0x58] sm:$0xff]  ;;  %2321 = vmatprep.subr.bf16.mxu1 %v2320_v14  ;;  %v1185_v14 = vld [vmem:[#allocation19 + $0x2d0] sm:$0xff] }
 0x67c   :  { %v2322_v17 = vpack.c.bf16 %v1392_v16, %v1391_v15  ;;  %v1188_v15 = vld [vmem:[#allocation19 + $0x2e8] sm:$0xff]  ;;  %v1190_v16 = vld [vmem:[#allocation19 + $0x2f8] sm:$0xff] }
 0x67e   :  { %2223 = vmatpush1.bf16.msra.mxu0 %v2222_v21  ;;  %2323 = vmatpush3.bf16.msra.mxu1 %v2322_v17  ;;  %v932_v21 = vrot.slane %v3171_v18, %v3164_v55  ;;  %v2262_v17 = vpack.c.bf16 %v1185_v14, %v1183_v12  ;;  %v1221_v12 = vld [vmem:[#allocation19 + $0x3f0] sm:$0xff] }
 0x67f   :  { %2225 = vmatprep.subr.bf16.mxu0 %v2224_v22  ;;  %v940_v22 = vrot.slane %v3171_v18, %v939_v19  ;;  %v2264_v19 = vpack.c.bf16 %v1190_v16, %v1188_v15  ;;  %v1409_v16 = vld [vmem:[#allocation21 + $0xe0] sm:$0xff] }
 0x682   :  { %2227 = vmatpush1.bf16.msra.mxu0 %v2226_v25 }
 0x683   :  { %2229 = vmatprep.subr.bf16.mxu0 %v2228_v28 }
 0x686   :  { %2231 = vmatpush1.bf16.msra.mxu0 %v2230_v31  ;;  %v1159_v31 = vld [vmem:[#allocation19 + $0x200] sm:$0xff] }
 0x687   :  { %2233 = vmatprep.subr.bf16.mxu0 %v2232_v34  ;;  %v2238_v38 = vpack.c.bf16 %v1161_v32, %v1159_v31 }
 0x68a   :  { %2235 = vmatpush1.bf16.msra.mxu0 %v2234_v37 }
 0x68b   :  { %2237 = vmatprep.subr.bf16.mxu0 %v2236_v40  ;;  %v2240_v40 = vpack.c.bf16 %v1166_v36, %v1164_v35  ;;  %v1200_v35 = vld [vmem:[#allocation19 + $0x348] sm:$0xff]  ;;  %v1202_v36 = vld [vmem:[#allocation19 + $0x358] sm:$0xff] }
 0x720   :  { %v1011_v23 = vpop.f32.mrb[2].mxu0  ;;  %v3179_v24 = vpop.f32.mrb[10].mxu1 }
 0x721   :  { %v1012_v25 = vadd.f32 %v1011_v23, %v928_v20  ;;  %v1013_v26 = vpop.f32.mrb[3].mxu0  ;;  %v1084_v27 = vpop.f32.mrb[11].mxu1  ;;  %v1187_v20 = vld [vmem:[#allocation19 + $0x2e0] sm:$0xff]  ;;  %v1194_v23 = vld [vmem:[#allocation19 + $0x318] sm:$0xff]  ;;  %v1083_v52 = vadd.f32 %v3179_v24, %v936_v3  ;;  %v1411_v24 = vld [vmem:[#allocation21 + $0xf0] sm:$0xff] }
 0x722   :  { %v1014_v28 = vadd.f32 %v1013_v26, %v932_v21  ;;  %v1085_v29 = vadd.f32 %v1084_v27, %v940_v22  ;;  %v1189_v21 = vld [vmem:[#allocation19 + $0x2f0] sm:$0xff]  ;;  %v1192_v22 = vld [vmem:[#allocation19 + $0x308] sm:$0xff]  ;;  %v1191_v27 = vld [vmem:[#allocation19 + $0x300] sm:$0xff] }
 0x723   :  { %v1087_v30 = vmul.f32 0.01, %v1012_v25  ;;  %v2268_v26 = vpack.c.bf16 %v1194_v23, %v1192_v22  ;;  %v1089_v15 = vmul.f32 0.01, %v1083_v52  ;;  %v1412_v23 = vld [vmem:[#allocation21 + $0xf8] sm:$0xff] }
 0x724   :  { %v1088_v33 = vmul.f32 0.01, %v1014_v28  ;;  %v1090_v34 = vmul.f32 0.01, %v1085_v29  ;;  %v1786_v3 = vld [vmem:[%s3329_s18] ss:$0 sm:$0xff] }
 0x725   :  { %v1091_v39 = vmax.f32 %v1012_v25, %v1087_v30  ;;  %v2266_v25 = vpack.c.bf16 %v1189_v21, %v1187_v20  ;;  %v1198_v30 = vld [vmem:[#allocation19 + $0x338] sm:$0xff]  ;;  %v1093_v18 = vmax.f32 %v1083_v52, %v1089_v15  ;;  %v1393_v20 = vld [vmem:[#allocation21 + $0x60] sm:$0xff]  ;;  %v1394_v21 = vld [vmem:[#allocation21 + $0x68] sm:$0xff] }
 0x726   :  { %v1092_v37 = vmax.f32 %v1014_v28, %v1088_v33  ;;  %v1094_v43 = vmax.f32 %v1085_v29, %v1090_v34  ;;  %v1193_v28 = vld [vmem:[#allocation19 + $0x310] sm:$0xff]  ;;  %v1196_v29 = vld [vmem:[#allocation19 + $0x328] sm:$0xff]  ;;  %v1195_v33 = vld [vmem:[#allocation19 + $0x320] sm:$0xff]  ;;  %v2326_v22 = vpack.c.bf16 %v1394_v21, %v1393_v20 }
 0x727   :  { %v2270_v31 = vpack.c.bf16 %v1193_v28, %v1191_v27  ;;  %v2272_v32 = vpack.c.bf16 %v1198_v30, %v1196_v29  ;;  %v1197_v34 = vld [vmem:[#allocation19 + $0x330] sm:$0xff]  ;;  %v1396_v27 = vld [vmem:[#allocation21 + $0x78] sm:$0xff]  ;;  %v1223_v29 = vld [vmem:[%s3327_s16] sm:$0x3] }
 0x728   :  { %1299 = vmatprep.mubr.f32.mxu0 %v1092_v37  ;;  %v2274_v37 = vpack.c.bf16 %v1197_v34, %v1195_v33  ;;  %v1228_v30 = vrot.slane %v1223_v29, %v3161_v53  ;;  %v1494_v53 = vld [vmem:[%s3330_s19 + $0x10] sm:$0xff]  ;;  %v1591_v15 = vld [vmem:[%s3332_s21 + $0x20] sm:$0xff] }
 0x729   :  { %1300 = vmatmul.mubr.f32.vlgmr.msra.gmra.mrb[4].mxu0 %v1091_v39  ;;  %v1199_v39 = vld [vmem:[#allocation19 + $0x340] sm:$0xff]  ;;  %v1787_v21 = vld [vmem:[%s3331_s20] ss:$0 sm:$0xff] }
 0x72a   :  { %2239 = vmatpush1.bf16.msra.mxu0 %v2238_v38  ;;  %1370 = vmatprep.mubr.f32.mxu0 %v1094_v43  ;;  %v2276_v38 = vpack.c.bf16 %v1202_v36, %v1200_v35 }
 0x72b   :  { %2241 = vmatprep.subr.bf16.mxu0 %v2240_v40  ;;  %v1201_v40 = vld [vmem:[#allocation19 + $0x350] sm:$0xff] }
 0x72c   :  { %v2278_v43 = vpack.c.bf16 %v1201_v40, %v1199_v39 }
 0x72e   :  { %2243 = vmatpush1.bf16.msra.mxu0 %v2242_v46  ;;  %v1205_v46 = vld [vmem:[#allocation19 + $0x370] sm:$0xff] }
 0x72f   :  { %2245 = vmatprep.subr.bf16.mxu0 %v2244_v47  ;;  %v1208_v47 = vld [vmem:[#allocation19 + $0x388] sm:$0xff]  ;;  %v2282_v49 = vpack.c.bf16 %v1205_v46, %v1203_v45  ;;  %v1497_v45 = vld [vmem:[%s3330_s19 + $0x28] sm:$0xff] }
 0x730   :  { %v2284_v50 = vpack.c.bf16 %v1210_v48, %v1208_v47  ;;  %v1498_v47 = vld [vmem:[%s3330_s19 + $0x30] sm:$0xff]  ;;  %v1499_v48 = vld [vmem:[%s3330_s19 + $0x38] sm:$0xff] }
 0x732   :  { %2247 = vmatpush1.bf16.msra.mxu0 %v2246_v54  ;;  %v1209_v54 = vld [vmem:[#allocation19 + $0x390] sm:$0xff] }
 0x733   :  { %2249 = vmatprep.subr.bf16.mxu0 %v2248_v56  ;;  %v1212_v56 = vld [vmem:[#allocation19 + $0x3a8] sm:$0xff]  ;;  %v2286_v58 = vpack.c.bf16 %v1209_v54, %v1207_v51  ;;  %v1501_v51 = vld [vmem:[%s3330_s19 + $0x48] sm:$0xff] }
 0x734   :  { %v2288_v60 = vpack.c.bf16 %v1214_v57, %v1212_v56  ;;  %v1502_v56 = vld [vmem:[%s3330_s19 + $0x50] sm:$0xff]  ;;  %v1503_v57 = vld [vmem:[%s3330_s19 + $0x58] sm:$0xff] }
 0x736   :  { %2251 = vmatpush1.bf16.msra.mxu0 %v2250_v61  ;;  %v1211_v61 = vld [vmem:[#allocation19 + $0x3a0] sm:$0xff] }
 0x737   :  { %2253 = vmatprep.subr.bf16.mxu0 %v2252_v62  ;;  %v1213_v62 = vld [vmem:[#allocation19 + $0x3b0] sm:$0xff] }
 0x738   :  { %v2290_v2 = vpack.c.bf16 %v1213_v62, %v1211_v61  ;;  %v1506_v62 = vld [vmem:[%s3330_s19 + $0x70] sm:$0xff] }
 0x73a   :  { %2255 = vmatpush1.bf16.msra.mxu0 %v2254_v4  ;;  %v2292_v4 = vpack.c.bf16 %v1218_v1, %v1216_v63  ;;  %v1507_v63 = vld [vmem:[%s3330_s19 + $0x78] sm:$0xff] }
 0x73b   :  { %2257 = vmatprep.subr.bf16.mxu0 %v2256_v5  ;;  %v1215_v5 = vld [vmem:[#allocation19 + $0x3c0] sm:$0xff]  ;;  %v2354_v1 = vpack.c.bf16 %v1507_v63, %v1506_v62 }
 0x73c   :  { %v2294_v9 = vpack.c.bf16 %v1217_v6, %v1215_v5 }
 0x73e   :  { %2259 = vmatpush1.bf16.msra.mxu0 %v2258_v10  ;;  %v2296_v10 = vpack.c.bf16 %v1222_v8, %v1220_v7  ;;  %v1587_v7 = vld [vmem:[%s3332_s21] sm:$0xff]  ;;  %v1588_v8 = vld [vmem:[%s3332_s21 + $0x8] sm:$0xff] }
 0x73f   :  { %2261 = vmatprep.subr.bf16.mxu0 %v2260_v11  ;;  %v1219_v11 = vld [vmem:[#allocation19 + $0x3e0] sm:$0xff]  ;;  %v2357_v52 = vpack.c.bf16 %v1588_v8, %v1587_v7 }
 0x740   :  { %v2298_v14 = vpack.c.bf16 %v1221_v12, %v1219_v11  ;;  %v1589_v11 = vld [vmem:[%s3332_s21 + $0x10] sm:$0xff]  ;;  %v1590_v12 = vld [vmem:[%s3332_s21 + $0x18] sm:$0xff] }
 0x742   :  { %2263 = vmatpush1.bf16.msra.mxu0 %v2262_v17  ;;  %v1410_v17 = vld [vmem:[#allocation21 + $0xe8] sm:$0xff] }
 0x743   :  { %2265 = vmatprep.subr.bf16.mxu0 %v2264_v19  ;;  %v2324_v19 = vpack.c.bf16 %v1410_v17, %v1409_v16  ;;  %v1593_v17 = vld [vmem:[%s3332_s21 + $0x30] sm:$0xff] }
 0x745   :  { %2325 = vmatprep.subr.bf16.mxu1 %v2324_v19  ;;  %v1594_v19 = vld [vmem:[%s3332_s21 + $0x38] sm:$0xff] }
 0x746   :  { %2267 = vmatpush1.bf16.msra.mxu0 %v2266_v25  ;;  %2327 = vmatpush3.bf16.msra.mxu1 %v2326_v22  ;;  %v2328_v25 = vpack.c.bf16 %v1412_v23, %v1411_v24  ;;  %v2366_v20 = vpack.c.bf16 %v1594_v19, %v1593_v17 }
 0x747   :  { %2269 = vmatprep.subr.bf16.mxu0 %v2268_v26  ;;  %v1395_v26 = vld [vmem:[#allocation21 + $0x70] sm:$0xff] }
 0x748   :  { %v2330_v28 = vpack.c.bf16 %v1396_v27, %v1395_v26  ;;  %2329 = vmatprep.subr.bf16.mxu1 %v2328_v25  ;;  %v1677_v27 = vld [vmem:[%s3334_s23] sm:$0xff] }
 0x74a   :  { %2271 = vmatpush1.bf16.msra.mxu0 %v2270_v31  ;;  %2331 = vmatpush3.bf16.msra.mxu1 %v2330_v28  ;;  %v1232_v31 = vrot.slane %v1223_v29, %v3164_v55  ;;  %v1495_v55 = vld [vmem:[%s3330_s19 + $0x18] sm:$0xff]  ;;  %v1678_v28 = vld [vmem:[%s3334_s23 + $0x8] sm:$0xff] }
 0x74b   :  { %2273 = vmatprep.subr.bf16.mxu0 %v2272_v32  ;;  %2332 = vmatprep.subr.bf16.mxu1 %v2721_v13  ;;  %v2369_v29 = vpack.c.bf16 %v1678_v28, %v1677_v27 }
 0x74e   :  { %2275 = vmatpush1.bf16.msra.mxu0 %v2274_v37  ;;  %v1492_v37 = vld [vmem:[%s3330_s19] sm:$0xff] }
 0x74f   :  { %2277 = vmatprep.subr.bf16.mxu0 %v2276_v38  ;;  %v1493_v38 = vld [vmem:[%s3330_s19 + $0x8] sm:$0xff] }
 0x750   :  { %v2333_v41 = vpack.c.bf16 %v1493_v38, %v1492_v37 }
 0x752   :  { %2279 = vmatpush1.bf16.msra.mxu0 %v2278_v43  ;;  %v2336_v43 = vpack.c.bf16 %v1495_v55, %v1494_v53 }
 0x753   :  { %2281 = vmatprep.subr.bf16.mxu0 %v2280_v44  ;;  %v1496_v44 = vld [vmem:[%s3330_s19 + $0x20] sm:$0xff] }
 0x754   :  { %v2339_v46 = vpack.c.bf16 %v1497_v45, %v1496_v44 }
 0x756   :  { %2283 = vmatpush1.bf16.msra.mxu0 %v2282_v49  ;;  %v2342_v49 = vpack.c.bf16 %v1499_v48, %v1498_v47 }
 0x757   :  { %2285 = vmatprep.subr.bf16.mxu0 %v2284_v50  ;;  %v1500_v50 = vld [vmem:[%s3330_s19 + $0x40] sm:$0xff] }
 0x758   :  { %v2345_v54 = vpack.c.bf16 %v1501_v51, %v1500_v50 }
 0x75a   :  { %2287 = vmatpush1.bf16.msra.mxu0 %v2286_v58  ;;  %v2348_v58 = vpack.c.bf16 %v1503_v57, %v1502_v56 }
 0x75b   :  { %2289 = vmatprep.subr.bf16.mxu0 %v2288_v60  ;;  %v1505_v60 = vld [vmem:[%s3330_s19 + $0x68] sm:$0xff] }
 0x75c   :  { %v2351_v61 = vpack.c.bf16 %v1505_v60, %v1504_v59 }
 0x75e   :  { %2291 = vmatpush1.bf16.msra.mxu0 %v2290_v2 }
 0x75f   :  { %2293 = vmatprep.subr.bf16.mxu0 %v2292_v4 }
 0x762   :  { %2295 = vmatpush1.bf16.msra.mxu0 %v2294_v9 }
 0x763   :  { %2297 = vmatprep.subr.bf16.mxu0 %v2296_v10 }
 0x766   :  { %2299 = vmatpush1.bf16.msra.mxu0 %v2298_v14  ;;  %v2360_v14 = vpack.c.bf16 %v1590_v12, %v1589_v11 }
 0x769   :  { %1371 = vmatmul.mubr.f32.vlgmr.msra.gmra.mrb[4].mxu0 %v1093_v18  ;;  %v1592_v18 = vld [vmem:[%s3332_s21 + $0x28] sm:$0xff] }
 0x76a   :  { %v2363_v16 = vpack.c.bf16 %v1592_v18, %v1591_v15 }
 0x83c   :  { %v1372_v32 = vpop.f32.mrb[4].mxu0 }
 0x83d   :  { %v2374_v33 = vadd.f32 %v1372_v32, %v1228_v30  ;;  %v1374_v34 = vpop.f32.mrb[5].mxu0  ;;  %v1679_v30 = vld [vmem:[%s3334_s23 + $0x10] sm:$0xff]  ;;  %v1788_v32 = vld [vmem:[%s3333_s22] ss:$0 sm:$0xff]  ;;  %s3373_s22 = sld [smem:[#allocation39_spill]] }
 0x83e   :  { %v2375_v35 = vadd.f32 %v1374_v34, %v1232_v31 }
 0x83f   :  { %v1377_v36 = vmul.f32 0.01, %v2374_v33 }
 0x840   :  { %v1378_v39 = vmul.f32 0.01, %v2375_v35 }
 0x841   :  { %v1379_v42 = vmax.f32 %v2374_v33, %v1377_v36 }
 0x842   :  { %v1380_v40 = vmax.f32 %v2375_v35, %v1378_v39 }
 0x844   :  { %1484 = vmatprep.mubr.f32.mxu1 %v1380_v40 }
 0x845   :  { %1485 = vmatmul.mubr.f32.vlgmr.msra.gmra.mrb[12].mxu1 %v1379_v42 }
 0x846   :  { %2334 = vmatpush3.bf16.msra.mxu1 %v2333_v41  ;;  %1958 = vmatprep.mubr.msk.f32.mxu1 %vm2720_vm0, %v2719_v0 }
 0x847   :  { %2335 = vmatprep.subr.bf16.mxu1 %v2721_v13 }
 0x84a   :  { %2337 = vmatpush3.bf16.msra.mxu1 %v2336_v43 }
 0x84b   :  { %2338 = vmatprep.subr.bf16.mxu1 %v2721_v13 }
 0x84e   :  { %2340 = vmatpush3.bf16.msra.mxu1 %v2339_v46 }
 0x84f   :  { %2341 = vmatprep.subr.bf16.mxu1 %v2721_v13 }
 0x852   :  { %2343 = vmatpush3.bf16.msra.mxu1 %v2342_v49 }
 0x853   :  { %2344 = vmatprep.subr.bf16.mxu1 %v2721_v13 }
 0x856   :  { %2346 = vmatpush3.bf16.msra.mxu1 %v2345_v54 }
 0x857   :  { %2347 = vmatprep.subr.bf16.mxu1 %v2721_v13 }
 0x85a   :  { %2349 = vmatpush3.bf16.msra.mxu1 %v2348_v58 }
 0x85b   :  { %2350 = vmatprep.subr.bf16.mxu1 %v2721_v13 }
 0x85e   :  { %2352 = vmatpush3.bf16.msra.mxu1 %v2351_v61 }
 0x85f   :  { %2353 = vmatprep.subr.bf16.mxu1 %v2721_v13 }
 0x862   :  { %2355 = vmatpush3.bf16.msra.mxu1 %v2354_v1 }
 0x863   :  { %2356 = vmatprep.subr.bf16.mxu1 %v2721_v13 }
 0x918   :  { %v1845_v2 = vpop.f32.mrb[12].mxu1 }
 0x919   :  { %v1846_v4 = vpop.f32.mrb[13].mxu1 }
 0x91a   :  { %v1847_v5 = vadd.f32 %v1846_v4, %v1845_v2 }
 0x91c   :  { %v1487_v6 = vadd.f32 %v1847_v5, %v1786_v3 }
 0x91e   :  { %v1490_v9 = vmul.f32 0.01, %v1487_v6 }
 0x920   :  { %v1491_v10 = vmax.f32 %v1487_v6, %v1490_v9 }
 0x922   :  { %1959 = vmatmul.mubr.f32.vlgmr.msra.gmra.mrb[14].mxu1 %v1491_v10 }
 0x923   :  { %2358 = vmatpush3.bf16.msra.mxu1 %v2357_v52  ;;  %1977 = vmatprep.mubr.msk.f32.mxu1 %vm2720_vm0, %v2719_v0 }
 0x924   :  { %2359 = vmatprep.subr.bf16.mxu1 %v2721_v13 }
 0x927   :  { %2361 = vmatpush3.bf16.msra.mxu1 %v2360_v14 }
 0x928   :  { %2362 = vmatprep.subr.bf16.mxu1 %v2721_v13 }
 0x92b   :  { %2364 = vmatpush3.bf16.msra.mxu1 %v2363_v16 }
 0x92c   :  { %2365 = vmatprep.subr.bf16.mxu1 %v2721_v13 }
 0x92f   :  { %2367 = vmatpush3.bf16.msra.mxu1 %v2366_v20 }
 0x930   :  { %2368 = vmatprep.subr.bf16.mxu1 %v2721_v13 }
 0x9f5   :  { %v1581_v22 = vpop.f32.mrb[14].mxu1 }
 0x9f6   :  { %v1582_v24 = vadd.f32 %v1787_v21, %v1581_v22  ;;  %v1960_v23 = vpop.f32.mrb[15].mxu1 }
 0x9f8   :  { %v1585_v25 = vmul.f32 0.01, %v1582_v24 }
 0x9fa   :  { %v1586_v26 = vmax.f32 %v1582_v24, %v1585_v25 }
 0x9fc   :  { %1978 = vmatmul.mubr.msk.f32.vlgmr.msra.gmra.mrb[16].mxu1 %vm600_vm6, %v1586_v26 }
 0x9fd   :  { %1988 = vmatprep.mubr.msk.f32.mxu1 %vm2720_vm0, %v2719_v0  ;;  %2370 = vmatpush3.bf16.msra.mxu1 %v2369_v29  ;;  %v1680_v0 = vld [vmem:[%s3334_s23 + $0x18] sm:$0xff] }
 0x9fe   :  { %2371 = vmatprep.subr.bf16.mxu1 %v2721_v13  ;;  %v2372_v31 = vpack.c.bf16 %v1680_v0, %v1679_v30  ;;  %v1790_v13 = vld [vmem:[%s3335_s24] ss:$0 sm:$0xff] }
 0xa01   :  { %2373 = vmatpush3.bf16.msra.mxu1 %v2372_v31 }
 0xacf   :  { %v1671_v33 = vpop.f32.mrb[16].mxu1 }
 0xad0   :  { %v1672_v34 = vadd.f32 %v1788_v32, %v1671_v33  ;;  %v1979_v35 = vpop.f32.mrb[17].mxu1 }
 0xad2   :  { %v1675_v36 = vmul.f32 0.01, %v1672_v34 }
 0xad4   :  { %v1676_v37 = vmax.f32 %v1672_v34, %v1675_v36 }
 0xad6   :  { %1989 = vmatmul.mubr.msk.f32.vlgmr.msra.gmra.mrb[18].mxu1 %vm509_vm5, %v1676_v37 }
 0xba9   :  { %v1757_v38 = vpop.f32.mrb[18].mxu1 }
 0xbaa   :  { %v1758_v39 = vadd.f32 %v1790_v13, %v1757_v38  ;;  %v1990_v40 = vpop.f32.mrb[19].mxu1 }
 0xbac   :  { %v1761_v41 = vmul.f32 0.01, %v1758_v39 }
 0xbae   :  { %v1762_v42 = vmax.f32 %v1758_v39, %v1761_v41 }
 0xbb0   :  { %1763 = vst.msk [vmem:[%s3373_s22] sm:$0xff] %vm249_vm2, %v1762_v42 }
 0xbb1   :  { %1768 = vsyncpa [#allocation3], 1 }
 0xbb2   :  { %1769 = vsyncpa [#allocation5], 1 }
 0xbb3   :  { %1770 = vsyncpa [#allocation8], 1 }
 0xbb4   :  { %1771 = vsyncpa [#allocation11], 1 }
 0xbb5   :  { %1772 = vsyncpa [#allocation14], 1 }
 0xbb6   :  { %1773 = vsyncpa [#allocation17], 1 }
 0xbb7   :  { %1774 = vsyncpa [#allocation20], 1 }

</bundles_post_ra>
